<compile_context>
chip_gen: v6e
topology: v6e:2x2x1
jax: 0.10.0
libtpu: 0.0.40
codegen_flags: <defaults>
</compile_context>

<pallas_src>
import math

import jax
import jax.numpy as jnp
from jax.experimental import pallas as pl
from jax.experimental.pallas import tpu as pltpu


# ----------------------------- model dims (small, synthetic) ---------------
B = 2           # batch
S = 8           # seq len
H = 256         # hidden_size
NH = 2          # num_attention_heads
HD = H // NH    # head_dim = 128 (lane-aligned)
I = 512         # intermediate_size
BS = B * S      # flattened rows for dense matmuls
RMS_EPS = 1e-6
NEG_MIN = float(jnp.finfo(jnp.float32).min)


def baichuan_layer_kernel(x_ref, slopes_ref, ln1_ref, ln2_ref,
                          wpack_ref, wo_ref, wgu_ref, wd_ref, out_ref):
    # Whole problem lives in VMEM (weights ~1.3 MiB bf16); single invocation.
    x = x_ref[...]                               # (BS, H) f32
    ln1 = ln1_ref[...]                           # (1, H)  f32
    ln2 = ln2_ref[...]                           # (1, H)  f32

    # ---- input RMSNorm (f32) ----
    var = jnp.mean(x * x, axis=-1, keepdims=True)
    h = x * jax.lax.rsqrt(var + RMS_EPS) * ln1   # (BS, H)

    # ---- packed QKV projection: bf16 x bf16 -> f32 acc ----
    # (1/sqrt(HD) already folded into the Q columns of wpack by the wrapper.)
    proj = jnp.dot(h.astype(jnp.bfloat16), wpack_ref[...],
                   preferred_element_type=jnp.float32)        # (BS, 3H)

    # ---- alibi + causal mask, built once (hoisted out of the loops) ----
    qi = jax.lax.broadcasted_iota(jnp.int32, (S, S), 0)
    ki = jax.lax.broadcasted_iota(jnp.int32, (S, S), 1)
    rel = (ki - qi).astype(jnp.float32)                       # (S, S)
    causal = ki > qi                                          # bool (S, S)
    alibi = [slopes_ref[hi] * rel for hi in range(NH)]        # NH x (S, S)

    # ---- attention: static loops over batch (2) and heads (2) ----
    attn_rows = []
    for b in range(B):
        # slice rows in f32 (8-row tile aligned), cast to bf16 once per batch
        proj_b = proj[b * S:(b + 1) * S, :].astype(jnp.bfloat16)   # (S, 3H)
        head_cols = []
        for hi in range(NH):
            qh = proj_b[:, hi * HD:(hi + 1) * HD]                  # (S, HD)
            kh = proj_b[:, H + hi * HD:H + (hi + 1) * HD]
            vh = proj_b[:, 2 * H + hi * HD:2 * H + (hi + 1) * HD]

            scores = jax.lax.dot_general(
                qh, kh, (((1,), (1,)), ((), ())),
                preferred_element_type=jnp.float32)                # (S, S)
            # additive alibi bias + causal masking, then torch.max(...) clamp
            scores = jnp.where(causal, NEG_MIN, scores + alibi[hi])
            scores = jnp.maximum(scores, NEG_MIN)

            # stable softmax (f32), reciprocal on the EUP
            m = jnp.max(scores, axis=-1, keepdims=True)
            p = jnp.exp(scores - m)
            p = p * pl.reciprocal(jnp.sum(p, axis=-1, keepdims=True),
                                  approx=True)

            head_cols.append(jnp.dot(p.astype(jnp.bfloat16), vh,
                                     preferred_element_type=jnp.float32))
        # lane-concat heads (128-aligned, free) -> (S, H)
        attn_rows.append(jnp.concatenate(head_cols, axis=1))
    attn = jnp.concatenate(attn_rows, axis=0)                      # (BS, H)

    # ---- single o_proj matmul over all batches/heads ----
    attn_o = jnp.dot(attn.astype(jnp.bfloat16), wo_ref[...],
                     preferred_element_type=jnp.float32)           # (BS, H)

    # ---- residual ----
    h1 = x + attn_o

    # ---- post-attention RMSNorm + fused SwiGLU MLP + residual ----
    var2 = jnp.mean(h1 * h1, axis=-1, keepdims=True)
    h2 = h1 * jax.lax.rsqrt(var2 + RMS_EPS) * ln2
    gu = jnp.dot(h2.astype(jnp.bfloat16), wgu_ref[...],
                 preferred_element_type=jnp.float32)               # (BS, 2I)
    g = gu[:, :I]
    u = gu[:, I:]
    g = g * jax.nn.sigmoid(g)                                      # silu (f32)
    mlp = jnp.dot((g * u).astype(jnp.bfloat16), wd_ref[...],
                  preferred_element_type=jnp.float32)              # (BS, H)

    out_ref[...] = h1 + mlp


def baichuan_layer(x, slopes, params):
    ln1, ln2, wpack, wo, wgu, wd = params

    # Fold the 1/sqrt(head_dim) attention scale into the Q columns of the
    # packed-QKV weight (done once, outside the kernel).
    scale = 1.0 / math.sqrt(HD)
    wq_scaled = (wpack[:, :H].astype(jnp.float32) * scale).astype(wpack.dtype)
    wpack_s = jnp.concatenate([wq_scaled, wpack[:, H:]], axis=1)

    x2d = x.reshape(BS, H)
    args = (x2d, slopes, ln1, ln2, wpack_s, wo, wgu, wd)

    # Derive VMEM limit from actual I/O footprint (+ headroom for f32
    # intermediates / internal scratch) instead of hardcoding 32 MiB.
    io_bytes = sum(int(a.size) * a.dtype.itemsize for a in args) + BS * H * 4
    vmem_limit = int(2 * io_bytes + (4 << 20))

    vmem = pl.BlockSpec(memory_space=pltpu.MemorySpace.VMEM)
    smem = pl.BlockSpec(memory_space=pltpu.MemorySpace.SMEM)
    out2d = pl.pallas_call(
        baichuan_layer_kernel,
        out_shape=jax.ShapeDtypeStruct((BS, H), jnp.float32),
        in_specs=[vmem, smem, vmem, vmem, vmem, vmem, vmem, vmem],
        out_specs=vmem,
        compiler_params=pltpu.CompilerParams(vmem_limit_bytes=vmem_limit),
    )(*args)
    return out2d.reshape(B, S, H)


# ----------------------------- pure-JAX reference ---------------------------
def reference(x, slopes, params):
    ln1, ln2, wpack, wo, wgu, wd = params
    # same (bf16-quantized) weights, math in f32
    wpack = wpack.astype(jnp.float32)
    wo = wo.astype(jnp.float32)
    wgu = wgu.astype(jnp.float32)
    wd = wd.astype(jnp.float32)

    def rms(t, w):
        var = jnp.mean(t * t, axis=-1, keepdims=True)
        return t * jax.lax.rsqrt(var + RMS_EPS) * w[0]

    h = rms(x, ln1)
    proj = h @ wpack
    q, k, v = jnp.split(proj, 3, axis=-1)
    q = q.reshape(B, S, NH, HD).transpose(0, 2, 1, 3)
    k = k.reshape(B, S, NH, HD).transpose(0, 2, 1, 3)
    v = v.reshape(B, S, NH, HD).transpose(0, 2, 1, 3)

    pos = jnp.arange(S, dtype=jnp.float32)
    rel = pos[None, :] - pos[:, None]
    causal = jnp.where(pos[None, :] > pos[:, None], NEG_MIN, 0.0)
    mask = slopes[:, None, None] * rel[None] + causal[None]     # (NH, S, S)

    scores = jnp.einsum('bhqd,bhkd->bhqk', q, k) / math.sqrt(HD) + mask[None]
    scores = jnp.maximum(scores, NEG_MIN)
    p = jax.nn.softmax(scores, axis=-1)
    a = jnp.einsum('bhqk,bhkd->bhqd', p, v).transpose(0, 2, 1, 3)
    a = a.reshape(B, S, H)
    h1 = x + a @ wo
    h2 = rms(h1, ln2)
    gu = h2 @ wgu
    g, u = gu[..., :I], gu[..., I:]
    return h1 + ((g * jax.nn.sigmoid(g)) * u) @ wd


if __name__ == "__main__":
    key = jax.random.PRNGKey(0)
    ks = jax.random.split(key, 8)
    std = 0.02
    x = jax.random.normal(ks[0], (B, S, H), jnp.float32)
    ln1 = jnp.ones((1, H), jnp.float32)
    ln2 = jnp.ones((1, H), jnp.float32)
    wpack = (std * jax.random.normal(ks[1], (H, 3 * H), jnp.float32)).astype(jnp.bfloat16)
    wo = (std * jax.random.normal(ks[2], (H, H), jnp.float32)).astype(jnp.bfloat16)
    wg = std * jax.random.normal(ks[3], (H, I), jnp.float32)
    wu = std * jax.random.normal(ks[4], (H, I), jnp.float32)
    wgu = jnp.concatenate([wg, wu], axis=1).astype(jnp.bfloat16)  # fused gate|up
    wd = (std * jax.random.normal(ks[5], (I, H), jnp.float32)).astype(jnp.bfloat16)
    params = (ln1, ln2, wpack, wo, wgu, wd)

    # Baichuan alibi slopes: 2^(-8*i/NH), i = 1..NH (compact mask representation)
    slopes = jnp.array([2.0 ** (-8.0 * (i + 1) / NH) for i in range(NH)],
                       jnp.float32)

    out = baichuan_layer(x, slopes, params)
    out = jax.block_until_ready(out)

    ref = reference(x, slopes, params)
    assert out.shape == (B, S, H)
    max_err = float(jnp.max(jnp.abs(out - ref)))
    assert jnp.allclose(out, ref, atol=2e-2, rtol=2e-2), f"mismatch: {max_err}"
    print("KERNEL_OK")
</pallas_src>

<mosaic_0001>
module attributes {stable_mosaic.version = 11 : i64} {
  func.func @baichuan_layer_kernel(%arg0: memref<16x256xf32, #tpu.memory_space<vmem>>, %arg1: memref<2xf32, #tpu.memory_space<smem>>, %arg2: memref<1x256xf32, #tpu.memory_space<vmem>>, %arg3: memref<1x256xf32, #tpu.memory_space<vmem>>, %arg4: memref<256x768xbf16, #tpu.memory_space<vmem>>, %arg5: memref<256x256xbf16, #tpu.memory_space<vmem>>, %arg6: memref<256x1024xbf16, #tpu.memory_space<vmem>>, %arg7: memref<512x256xbf16, #tpu.memory_space<vmem>>, %arg8: memref<16x256xf32, #tpu.memory_space<vmem>>) attributes {dimension_semantics = [], scalar_prefetch = 0 : i64, scratch_operands = 0 : i64, tpu.core_type = #tpu.core_type<tc>} {
    %c0 = arith.constant 0 : index
    %c0_0 = arith.constant 0 : index
    %0 = vector.load %arg0[%c0, %c0_0] : memref<16x256xf32, #tpu.memory_space<vmem>>, vector<16x256xf32>
    %c0_1 = arith.constant 0 : index
    %c0_2 = arith.constant 0 : index
    %1 = vector.load %arg2[%c0_1, %c0_2] : memref<1x256xf32, #tpu.memory_space<vmem>>, vector<1x256xf32>
    %c0_3 = arith.constant 0 : index
    %c0_4 = arith.constant 0 : index
    %2 = vector.load %arg3[%c0_3, %c0_4] : memref<1x256xf32, #tpu.memory_space<vmem>>, vector<1x256xf32>
    %3 = arith.mulf %0, %0 : vector<16x256xf32>
    %cst = arith.constant dense<0.000000e+00> : vector<16xf32>
    %4 = vector.multi_reduction <add>, %3, %cst [1] : vector<16x256xf32> to vector<16xf32>
    %5 = vector.shape_cast %4 : vector<16xf32> to vector<16x1xf32>
    %cst_5 = arith.constant 2.560000e+02 : f32
    %6 = vector.broadcast %cst_5 : f32 to vector<16x1xf32>
    %7 = arith.divf %5, %6 : vector<16x1xf32>
    %cst_6 = arith.constant 9.99999997E-7 : f32
    %8 = vector.broadcast %cst_6 : f32 to vector<16x1xf32>
    %9 = arith.addf %7, %8 : vector<16x1xf32>
    %10 = math.rsqrt %9 : vector<16x1xf32>
    %11 = vector.broadcast %10 : vector<16x1xf32> to vector<16x256xf32>
    %12 = arith.mulf %0, %11 : vector<16x256xf32>
    %13 = vector.broadcast %1 : vector<1x256xf32> to vector<16x256xf32>
    %14 = arith.mulf %12, %13 : vector<16x256xf32>
    %15 = arith.truncf %14 : vector<16x256xf32> to vector<16x256xbf16>
    %c0_7 = arith.constant 0 : index
    %c0_8 = arith.constant 0 : index
    %16 = vector.load %arg4[%c0_7, %c0_8] : memref<256x768xbf16, #tpu.memory_space<vmem>>, vector<256x768xbf16>
    %cst_9 = arith.constant dense<0.000000e+00> : vector<16x768xf32>
    %17 = tpu.matmul %15, %16, %cst_9 {dimension_numbers = #tpu.dot_dimension_numbers<[1], [0], [0], [1], [0, 0, 1, 1], [], []>} : vector<16x256xbf16>, vector<256x768xbf16>, vector<16x768xf32> -> vector<16x768xf32>
    %18 = tpu.iota {dimensions = array<i32: 0>} : vector<8x8xi32>
    %19 = tpu.iota {dimensions = array<i32: 1>} : vector<8x8xi32>
    %20 = arith.subi %19, %18 : vector<8x8xi32>
    %21 = arith.sitofp %20 : vector<8x8xi32> to vector<8x8xf32>
    %22 = arith.cmpi sgt, %19, %18 : vector<8x8xi32>
    %c0_10 = arith.constant 0 : index
    %23 = memref.load %arg1[%c0_10] : memref<2xf32, #tpu.memory_space<smem>>
    %24 = vector.broadcast %23 : f32 to vector<8x8xf32>
    %25 = arith.mulf %24, %21 : vector<8x8xf32>
    %c1 = arith.constant 1 : index
    %26 = memref.load %arg1[%c1] : memref<2xf32, #tpu.memory_space<smem>>
    %27 = vector.broadcast %26 : f32 to vector<8x8xf32>
    %28 = arith.mulf %27, %21 : vector<8x8xf32>
    %29 = vector.extract_strided_slice %17 {offsets = [0, 0], sizes = [8, 768], strides = [1, 1]} : vector<16x768xf32> to vector<8x768xf32>
    %30 = arith.truncf %29 : vector<8x768xf32> to vector<8x768xbf16>
    %31 = vector.extract_strided_slice %30 {offsets = [0, 0], sizes = [8, 128], strides = [1, 1]} : vector<8x768xbf16> to vector<8x128xbf16>
    %32 = vector.extract_strided_slice %30 {offsets = [0, 256], sizes = [8, 128], strides = [1, 1]} : vector<8x768xbf16> to vector<8x128xbf16>
    %33 = vector.extract_strided_slice %30 {offsets = [0, 512], sizes = [8, 128], strides = [1, 1]} : vector<8x768xbf16> to vector<8x128xbf16>
    %cst_11 = arith.constant dense<0.000000e+00> : vector<8x8xf32>
    %34 = tpu.matmul %31, %32, %cst_11 {dimension_numbers = #tpu.dot_dimension_numbers<[1], [1], [0], [0], [0, 0, 1, 0], [], []>} : vector<8x128xbf16>, vector<8x128xbf16>, vector<8x8xf32> -> vector<8x8xf32>
    %35 = arith.addf %34, %25 : vector<8x8xf32>
    %cst_12 = arith.constant -3.40282347E+38 : f32
    %36 = vector.broadcast %cst_12 : f32 to vector<8x8xf32>
    %37 = arith.select %22, %36, %35 : vector<8x8xi1>, vector<8x8xf32>
    %cst_13 = arith.constant -3.40282347E+38 : f32
    %38 = vector.broadcast %cst_13 : f32 to vector<8x8xf32>
    %39 = arith.maximumf %37, %38 : vector<8x8xf32>
    %cst_14 = arith.constant dense<0xFF800000> : vector<8xf32>
    %40 = vector.multi_reduction <maximumf>, %39, %cst_14 [1] : vector<8x8xf32> to vector<8xf32>
    %41 = vector.shape_cast %40 : vector<8xf32> to vector<8x1xf32>
    %42 = vector.broadcast %41 : vector<8x1xf32> to vector<8x8xf32>
    %43 = arith.subf %39, %42 : vector<8x8xf32>
    %44 = math.exp %43 : vector<8x8xf32>
    %cst_15 = arith.constant dense<0.000000e+00> : vector<8xf32>
    %45 = vector.multi_reduction <add>, %44, %cst_15 [1] : vector<8x8xf32> to vector<8xf32>
    %46 = vector.shape_cast %45 : vector<8xf32> to vector<8x1xf32>
    %47 = tpu.reciprocal %46 {approx = true} : vector<8x1xf32> -> vector<8x1xf32>
    %48 = vector.broadcast %47 : vector<8x1xf32> to vector<8x8xf32>
    %49 = arith.mulf %44, %48 : vector<8x8xf32>
    %50 = arith.truncf %49 : vector<8x8xf32> to vector<8x8xbf16>
    %cst_16 = arith.constant dense<0.000000e+00> : vector<8x128xf32>
    %51 = tpu.matmul %50, %33, %cst_16 {dimension_numbers = #tpu.dot_dimension_numbers<[1], [0], [0], [1], [0, 0, 1, 1], [], []>} : vector<8x8xbf16>, vector<8x128xbf16>, vector<8x128xf32> -> vector<8x128xf32>
    %52 = vector.extract_strided_slice %30 {offsets = [0, 128], sizes = [8, 128], strides = [1, 1]} : vector<8x768xbf16> to vector<8x128xbf16>
    %53 = vector.extract_strided_slice %30 {offsets = [0, 384], sizes = [8, 128], strides = [1, 1]} : vector<8x768xbf16> to vector<8x128xbf16>
    %54 = vector.extract_strided_slice %30 {offsets = [0, 640], sizes = [8, 128], strides = [1, 1]} : vector<8x768xbf16> to vector<8x128xbf16>
    %cst_17 = arith.constant dense<0.000000e+00> : vector<8x8xf32>
    %55 = tpu.matmul %52, %53, %cst_17 {dimension_numbers = #tpu.dot_dimension_numbers<[1], [1], [0], [0], [0, 0, 1, 0], [], []>} : vector<8x128xbf16>, vector<8x128xbf16>, vector<8x8xf32> -> vector<8x8xf32>
    %56 = arith.addf %55, %28 : vector<8x8xf32>
    %cst_18 = arith.constant -3.40282347E+38 : f32
    %57 = vector.broadcast %cst_18 : f32 to vector<8x8xf32>
    %58 = arith.select %22, %57, %56 : vector<8x8xi1>, vector<8x8xf32>
    %cst_19 = arith.constant -3.40282347E+38 : f32
    %59 = vector.broadcast %cst_19 : f32 to vector<8x8xf32>
    %60 = arith.maximumf %58, %59 : vector<8x8xf32>
    %cst_20 = arith.constant dense<0xFF800000> : vector<8xf32>
    %61 = vector.multi_reduction <maximumf>, %60, %cst_20 [1] : vector<8x8xf32> to vector<8xf32>
    %62 = vector.shape_cast %61 : vector<8xf32> to vector<8x1xf32>
    %63 = vector.broadcast %62 : vector<8x1xf32> to vector<8x8xf32>
    %64 = arith.subf %60, %63 : vector<8x8xf32>
    %65 = math.exp %64 : vector<8x8xf32>
    %cst_21 = arith.constant dense<0.000000e+00> : vector<8xf32>
    %66 = vector.multi_reduction <add>, %65, %cst_21 [1] : vector<8x8xf32> to vector<8xf32>
    %67 = vector.shape_cast %66 : vector<8xf32> to vector<8x1xf32>
    %68 = tpu.reciprocal %67 {approx = true} : vector<8x1xf32> -> vector<8x1xf32>
    %69 = vector.broadcast %68 : vector<8x1xf32> to vector<8x8xf32>
    %70 = arith.mulf %65, %69 : vector<8x8xf32>
    %71 = arith.truncf %70 : vector<8x8xf32> to vector<8x8xbf16>
    %cst_22 = arith.constant dense<0.000000e+00> : vector<8x128xf32>
    %72 = tpu.matmul %71, %54, %cst_22 {dimension_numbers = #tpu.dot_dimension_numbers<[1], [0], [0], [1], [0, 0, 1, 1], [], []>} : vector<8x8xbf16>, vector<8x128xbf16>, vector<8x128xf32> -> vector<8x128xf32>
    %73 = tpu.concatenate %51, %72 in 1 : vector<8x128xf32>, vector<8x128xf32> -> vector<8x256xf32>
    %74 = vector.extract_strided_slice %17 {offsets = [8, 0], sizes = [8, 768], strides = [1, 1]} : vector<16x768xf32> to vector<8x768xf32>
    %75 = arith.truncf %74 : vector<8x768xf32> to vector<8x768xbf16>
    %76 = vector.extract_strided_slice %75 {offsets = [0, 0], sizes = [8, 128], strides = [1, 1]} : vector<8x768xbf16> to vector<8x128xbf16>
    %77 = vector.extract_strided_slice %75 {offsets = [0, 256], sizes = [8, 128], strides = [1, 1]} : vector<8x768xbf16> to vector<8x128xbf16>
    %78 = vector.extract_strided_slice %75 {offsets = [0, 512], sizes = [8, 128], strides = [1, 1]} : vector<8x768xbf16> to vector<8x128xbf16>
    %cst_23 = arith.constant dense<0.000000e+00> : vector<8x8xf32>
    %79 = tpu.matmul %76, %77, %cst_23 {dimension_numbers = #tpu.dot_dimension_numbers<[1], [1], [0], [0], [0, 0, 1, 0], [], []>} : vector<8x128xbf16>, vector<8x128xbf16>, vector<8x8xf32> -> vector<8x8xf32>
    %80 = arith.addf %79, %25 : vector<8x8xf32>
    %cst_24 = arith.constant -3.40282347E+38 : f32
    %81 = vector.broadcast %cst_24 : f32 to vector<8x8xf32>
    %82 = arith.select %22, %81, %80 : vector<8x8xi1>, vector<8x8xf32>
    %cst_25 = arith.constant -3.40282347E+38 : f32
    %83 = vector.broadcast %cst_25 : f32 to vector<8x8xf32>
    %84 = arith.maximumf %82, %83 : vector<8x8xf32>
    %cst_26 = arith.constant dense<0xFF800000> : vector<8xf32>
    %85 = vector.multi_reduction <maximumf>, %84, %cst_26 [1] : vector<8x8xf32> to vector<8xf32>
    %86 = vector.shape_cast %85 : vector<8xf32> to vector<8x1xf32>
    %87 = vector.broadcast %86 : vector<8x1xf32> to vector<8x8xf32>
    %88 = arith.subf %84, %87 : vector<8x8xf32>
    %89 = math.exp %88 : vector<8x8xf32>
    %cst_27 = arith.constant dense<0.000000e+00> : vector<8xf32>
    %90 = vector.multi_reduction <add>, %89, %cst_27 [1] : vector<8x8xf32> to vector<8xf32>
    %91 = vector.shape_cast %90 : vector<8xf32> to vector<8x1xf32>
    %92 = tpu.reciprocal %91 {approx = true} : vector<8x1xf32> -> vector<8x1xf32>
    %93 = vector.broadcast %92 : vector<8x1xf32> to vector<8x8xf32>
    %94 = arith.mulf %89, %93 : vector<8x8xf32>
    %95 = arith.truncf %94 : vector<8x8xf32> to vector<8x8xbf16>
    %cst_28 = arith.constant dense<0.000000e+00> : vector<8x128xf32>
    %96 = tpu.matmul %95, %78, %cst_28 {dimension_numbers = #tpu.dot_dimension_numbers<[1], [0], [0], [1], [0, 0, 1, 1], [], []>} : vector<8x8xbf16>, vector<8x128xbf16>, vector<8x128xf32> -> vector<8x128xf32>
    %97 = vector.extract_strided_slice %75 {offsets = [0, 128], sizes = [8, 128], strides = [1, 1]} : vector<8x768xbf16> to vector<8x128xbf16>
    %98 = vector.extract_strided_slice %75 {offsets = [0, 384], sizes = [8, 128], strides = [1, 1]} : vector<8x768xbf16> to vector<8x128xbf16>
    %99 = vector.extract_strided_slice %75 {offsets = [0, 640], sizes = [8, 128], strides = [1, 1]} : vector<8x768xbf16> to vector<8x128xbf16>
    %cst_29 = arith.constant dense<0.000000e+00> : vector<8x8xf32>
    %100 = tpu.matmul %97, %98, %cst_29 {dimension_numbers = #tpu.dot_dimension_numbers<[1], [1], [0], [0], [0, 0, 1, 0], [], []>} : vector<8x128xbf16>, vector<8x128xbf16>, vector<8x8xf32> -> vector<8x8xf32>
    %101 = arith.addf %100, %28 : vector<8x8xf32>
    %cst_30 = arith.constant -3.40282347E+38 : f32
    %102 = vector.broadcast %cst_30 : f32 to vector<8x8xf32>
    %103 = arith.select %22, %102, %101 : vector<8x8xi1>, vector<8x8xf32>
    %cst_31 = arith.constant -3.40282347E+38 : f32
    %104 = vector.broadcast %cst_31 : f32 to vector<8x8xf32>
    %105 = arith.maximumf %103, %104 : vector<8x8xf32>
    %cst_32 = arith.constant dense<0xFF800000> : vector<8xf32>
    %106 = vector.multi_reduction <maximumf>, %105, %cst_32 [1] : vector<8x8xf32> to vector<8xf32>
    %107 = vector.shape_cast %106 : vector<8xf32> to vector<8x1xf32>
    %108 = vector.broadcast %107 : vector<8x1xf32> to vector<8x8xf32>
    %109 = arith.subf %105, %108 : vector<8x8xf32>
    %110 = math.exp %109 : vector<8x8xf32>
    %cst_33 = arith.constant dense<0.000000e+00> : vector<8xf32>
    %111 = vector.multi_reduction <add>, %110, %cst_33 [1] : vector<8x8xf32> to vector<8xf32>
    %112 = vector.shape_cast %111 : vector<8xf32> to vector<8x1xf32>
    %113 = tpu.reciprocal %112 {approx = true} : vector<8x1xf32> -> vector<8x1xf32>
    %114 = vector.broadcast %113 : vector<8x1xf32> to vector<8x8xf32>
    %115 = arith.mulf %110, %114 : vector<8x8xf32>
    %116 = arith.truncf %115 : vector<8x8xf32> to vector<8x8xbf16>
    %cst_34 = arith.constant dense<0.000000e+00> : vector<8x128xf32>
    %117 = tpu.matmul %116, %99, %cst_34 {dimension_numbers = #tpu.dot_dimension_numbers<[1], [0], [0], [1], [0, 0, 1, 1], [], []>} : vector<8x8xbf16>, vector<8x128xbf16>, vector<8x128xf32> -> vector<8x128xf32>
    %118 = tpu.concatenate %96, %117 in 1 : vector<8x128xf32>, vector<8x128xf32> -> vector<8x256xf32>
    %119 = tpu.concatenate %73, %118 in 0 : vector<8x256xf32>, vector<8x256xf32> -> vector<16x256xf32>
    %120 = arith.truncf %119 : vector<16x256xf32> to vector<16x256xbf16>
    %c0_35 = arith.constant 0 : index
    %c0_36 = arith.constant 0 : index
    %121 = vector.load %arg5[%c0_35, %c0_36] : memref<256x256xbf16, #tpu.memory_space<vmem>>, vector<256x256xbf16>
    %cst_37 = arith.constant dense<0.000000e+00> : vector<16x256xf32>
    %122 = tpu.matmul %120, %121, %cst_37 {dimension_numbers = #tpu.dot_dimension_numbers<[1], [0], [0], [1], [0, 0, 1, 1], [], []>} : vector<16x256xbf16>, vector<256x256xbf16>, vector<16x256xf32> -> vector<16x256xf32>
    %123 = arith.addf %0, %122 : vector<16x256xf32>
    %124 = arith.mulf %123, %123 : vector<16x256xf32>
    %cst_38 = arith.constant dense<0.000000e+00> : vector<16xf32>
    %125 = vector.multi_reduction <add>, %124, %cst_38 [1] : vector<16x256xf32> to vector<16xf32>
    %126 = vector.shape_cast %125 : vector<16xf32> to vector<16x1xf32>
    %cst_39 = arith.constant 2.560000e+02 : f32
    %127 = vector.broadcast %cst_39 : f32 to vector<16x1xf32>
    %128 = arith.divf %126, %127 : vector<16x1xf32>
    %cst_40 = arith.constant 9.99999997E-7 : f32
    %129 = vector.broadcast %cst_40 : f32 to vector<16x1xf32>
    %130 = arith.addf %128, %129 : vector<16x1xf32>
    %131 = math.rsqrt %130 : vector<16x1xf32>
    %132 = vector.broadcast %131 : vector<16x1xf32> to vector<16x256xf32>
    %133 = arith.mulf %123, %132 : vector<16x256xf32>
    %134 = vector.broadcast %2 : vector<1x256xf32> to vector<16x256xf32>
    %135 = arith.mulf %133, %134 : vector<16x256xf32>
    %136 = arith.truncf %135 : vector<16x256xf32> to vector<16x256xbf16>
    %c0_41 = arith.constant 0 : index
    %c0_42 = arith.constant 0 : index
    %137 = vector.load %arg6[%c0_41, %c0_42] : memref<256x1024xbf16, #tpu.memory_space<vmem>>, vector<256x1024xbf16>
    %cst_43 = arith.constant dense<0.000000e+00> : vector<16x1024xf32>
    %138 = tpu.matmul %136, %137, %cst_43 {dimension_numbers = #tpu.dot_dimension_numbers<[1], [0], [0], [1], [0, 0, 1, 1], [], []>} : vector<16x256xbf16>, vector<256x1024xbf16>, vector<16x1024xf32> -> vector<16x1024xf32>
    %139 = vector.extract_strided_slice %138 {offsets = [0, 0], sizes = [16, 512], strides = [1, 1]} : vector<16x1024xf32> to vector<16x512xf32>
    %140 = vector.extract_strided_slice %138 {offsets = [0, 512], sizes = [16, 512], strides = [1, 1]} : vector<16x1024xf32> to vector<16x512xf32>
    %141 = arith.negf %139 : vector<16x512xf32>
    %142 = math.exp %141 : vector<16x512xf32>
    %cst_44 = arith.constant 1.000000e+00 : f32
    %143 = vector.broadcast %cst_44 : f32 to vector<16x512xf32>
    %144 = arith.addf %143, %142 : vector<16x512xf32>
    %145 = arith.divf %143, %144 : vector<16x512xf32>
    %146 = arith.mulf %139, %145 : vector<16x512xf32>
    %147 = arith.mulf %146, %140 : vector<16x512xf32>
    %148 = arith.truncf %147 : vector<16x512xf32> to vector<16x512xbf16>
    %c0_45 = arith.constant 0 : index
    %c0_46 = arith.constant 0 : index
    %149 = vector.load %arg7[%c0_45, %c0_46] : memref<512x256xbf16, #tpu.memory_space<vmem>>, vector<512x256xbf16>
    %cst_47 = arith.constant dense<0.000000e+00> : vector<16x256xf32>
    %150 = tpu.matmul %148, %149, %cst_47 {dimension_numbers = #tpu.dot_dimension_numbers<[1], [0], [0], [1], [0, 0, 1, 1], [], []>} : vector<16x512xbf16>, vector<512x256xbf16>, vector<16x256xf32> -> vector<16x256xf32>
    %151 = arith.addf %123, %150 : vector<16x256xf32>
    %c0_48 = arith.constant 0 : index
    %c0_49 = arith.constant 0 : index
    %152 = vector.load %arg8[%c0_48, %c0_49] : memref<16x256xf32, #tpu.memory_space<vmem>>, vector<16x256xf32>
    tpu.vector_store %arg8[%c0_48, %c0_49], %151 {strides = array<i32>} : memref<16x256xf32, #tpu.memory_space<vmem>>, vector<16x256xf32>,
    return
  }
}

</mosaic_0001>

<bundles_post_ra>
// kernel: tpu_custom_call.1
= control target key start
LH: loop header
LB: loop body
LE: loop exit
PB: predicated region body
PF: predicated region fallthrough
CT: control target
= control target key end

     0   :  { %13 = vsyncpa [#allocation3], 0  ;;  %s4243_s0 = inlined_call_operand.hbm [shape: f32[16,256], index: 0, kind: input, shape index: {}]   ;;  %s4244_s1 = inlined_call_operand.vmem [shape: f32[2], index: 1, kind: input, shape index: {}]   ;;  %s4245_s2 = inlined_call_operand.vmem [shape: f32[1,256], index: 2, kind: input, shape index: {}]   ;;  %s4246_s3 = inlined_call_operand.vmem [shape: f32[1,256], index: 3, kind: input, shape index: {}]   ;;  %s4247_s4 = inlined_call_operand.hbm [shape: bf16[256,768], index: 4, kind: input, shape index: {}]   ;;  %s4248_s5 = inlined_call_operand.hbm [shape: bf16[256,256], index: 5, kind: input, shape index: {}]   ;;  %s4249_s6 = inlined_call_operand.hbm [shape: bf16[256,1024], index: 6, kind: input, shape index: {}]   ;;  %s4250_s7 = inlined_call_operand.hbm [shape: bf16[512,256], index: 7, kind: input, shape index: {}]   ;;  %s4251_s8 = inlined_call_operand.hbm [shape: f32[16,256], index: 8, kind: output, shape index: {}]  }
   0x1   :  { %14 = vsyncpa [#allocation5], 0 }
   0x2   :  { %15 = vsyncpa [#allocation8], 0 }
   0x3   :  { %16 = vsyncpa [#allocation11], 0 }
   0x4   :  { %17 = vsyncpa [#allocation4], 0  ;;  %s3976_s27 = smov [#allocation7]  }
   0x5   :  { %s49_s28 = sshll.u32 %s3976_s27, 4  ;;  %s50_s28 = int_to_ptr.vmem [resolvable:$true] %s49_s28 }
   0x6   :  { %s3842_s29 = scalar_lea.vmem %s50_s28, 12288  ;;  %p3847_p1 = scmp.lt.s32.totalorder %s50_s28, %s50_s28 }
   0x7   :  { %p3843_p0 = scmp.ne.s32.totalorder %s50_s28, %s3842_s29  ;;  %p3848_p2 = scmp.lt.s32.totalorder %s3842_s29, %s3842_s29 }
   0x9   :  { %p3849_p3 = por %p3848_p2, %p3847_p1 }
   0xb   :  { %p3850_p4 = pnand %p3849_p3, %p3843_p0 }
   0xd   :  { %3853 = shalt.err (!%p3850_p4)
}
   0xe   :  { %s3977_s30 = smov 384   ;;  %s3978_s9 = smov 24  }
   0xf   :  { %55 = dma.hbm_to_vmem [thread:$0]  %s4247_s4, 12288, %s50_s28, [#allocation8], %s3977_s30, %s3977_s30, %s3978_s9  }
  0x10   :  { %s3979_s12 = smov [#allocation10]  }
  0x11   :  { %s73_s13 = sshll.u32 %s3979_s12, 4  ;;  %s74_s13 = int_to_ptr.vmem [resolvable:$true] %s73_s13 }
  0x12   :  { %s3862_s14 = scalar_lea.vmem %s74_s13, 16384  ;;  %p3867_p6 = scmp.lt.s32.totalorder %s74_s13, %s74_s13 }
  0x13   :  { %p3863_p5 = scmp.ne.s32.totalorder %s74_s13, %s3862_s14  ;;  %p3868_p7 = scmp.lt.s32.totalorder %s3862_s14, %s3862_s14 }
  0x15   :  { %p3869_p8 = por %p3868_p7, %p3867_p6 }
  0x17   :  { %p3870_p9 = pnand %p3869_p8, %p3863_p5 }
  0x19   :  { %3873 = shalt.err (!%p3870_p9)
}
  0x1a   :  { %s3980_s15 = smov 512   ;;  %s3981_s16 = smov 32  }
  0x1b   :  { %79 = dma.hbm_to_vmem [thread:$0]  %s4249_s6, 16384, %s74_s13, [#allocation11], %s3980_s15, %s3980_s15, %s3981_s16  }
  0x1c   :  { %s3982_s19 = smov [#allocation2]   ;;  %s36_s22 = sshll.u32 %s4244_s1, 4  ;;  %s37_s22 = int_to_ptr.vmem [resolvable:$true] %s36_s22 }
  0x1d   :  { %s23_s20 = sshll.u32 %s3982_s19, 4  ;;  %s24_s20 = int_to_ptr.vmem [resolvable:$true] %s23_s20 }
  0x1e   :  { %s3882_s23 = scalar_lea.vmem %s24_s20, 512  ;;  %p3887_p11 = scmp.lt.s32.totalorder %s24_s20, %s24_s20 }
  0x1f   :  { %p3883_p10 = scmp.ne.s32.totalorder %s24_s20, %s3882_s23  ;;  %p3888_p12 = scmp.lt.s32.totalorder %s3882_s23, %s3882_s23 }
  0x21   :  { %p3889_p13 = por %p3888_p12, %p3887_p11 }
  0x23   :  { %p3890_p0 = pnand %p3889_p13, %p3883_p10 }
  0x25   :  { %3893 = shalt.err (!%p3890_p0)
}
  0x26   :  { %s3983_s24 = smov 256   ;;  %s3984_s25 = smov 16  }
  0x27   :  { %29 = dma.hbm_to_vmem [thread:$0]  %s4243_s0, 512, %s24_s20, [#allocation3], %s3983_s24, %s3983_s24, %s3984_s25  }
  0x28   :  { %s3894_s27 = scalar_lea.vmem %s37_s22, 16  ;;  %p3899_p2 = scmp.lt.s32.totalorder %s37_s22, %s37_s22 }
  0x29   :  { %p3895_p1 = scmp.ne.s32.totalorder %s37_s22, %s3894_s27  ;;  %p3900_p3 = scmp.lt.s32.totalorder %s3894_s27, %s3894_s27 }
  0x2b   :  { %p3901_p4 = por %p3900_p3, %p3899_p2 }
  0x2d   :  { %p3902_p5 = pnand %p3901_p4, %p3895_p1 }
  0x2f   :  { %3905 = shalt.err (!%p3902_p5)
}
  0x30   :  { %s3985_s1 = smov [#allocation6]   ;;  %s3986_s28 = smov [#allocation9]  }
  0x31   :  { %39 = dma.vmem_to_smem %s37_s22, 16, %s3985_s1, [#allocation5]  }
  0x32   :  { %s61_s29 = sshll.u32 %s3986_s28, 4  ;;  %s62_s29 = int_to_ptr.vmem [resolvable:$true] %s61_s29 }
  0x33   :  { %s3914_s30 = scalar_lea.vmem %s62_s29, 4096  ;;  %p3919_p7 = scmp.lt.s32.totalorder %s62_s29, %s62_s29 }
  0x34   :  { %p3915_p6 = scmp.ne.s32.totalorder %s62_s29, %s3914_s30  ;;  %p3920_p8 = scmp.lt.s32.totalorder %s3914_s30, %s3914_s30 }
  0x36   :  { %p3921_p9 = por %p3920_p8, %p3919_p7 }
  0x38   :  { %p3922_p10 = pnand %p3921_p9, %p3915_p6 }
  0x3a   :  { %3925 = shalt.err (!%p3922_p10)
}
  0x3b   :  { %s3987_s0 = smov 128   ;;  %s3988_s9 = smov 8  }
  0x3c   :  { %67 = dma.hbm_to_vmem [thread:$0]  %s4248_s5, 4096, %s62_s29, [#allocation8], %s3987_s0, %s3987_s0, %s3988_s9  }
  0x3d   :  { %s3989_s12 = smov [#allocation12]  }
  0x3e   :  { %s85_s13 = sshll.u32 %s3989_s12, 4  ;;  %s86_s13 = int_to_ptr.vmem [resolvable:$true] %s85_s13 }
  0x3f   :  { %s3934_s14 = scalar_lea.vmem %s86_s13, 8192  ;;  %p3939_p12 = scmp.lt.s32.totalorder %s86_s13, %s86_s13 }
  0x40   :  { %p3935_p11 = scmp.ne.s32.totalorder %s86_s13, %s3934_s14  ;;  %p3940_p13 = scmp.lt.s32.totalorder %s3934_s14, %s3934_s14 }
  0x42   :  { %p3941_p0 = por %p3940_p13, %p3939_p12 }
  0x44   :  { %p3942_p1 = pnand %p3941_p0, %p3935_p11 }
  0x46   :  { %3945 = shalt.err (!%p3942_p1)
}
  0x47   :  { %91 = dma.hbm_to_vmem [thread:$0]  %s4250_s7, 8192, %s86_s13, [#allocation11], %s3987_s0, %s3987_s0, %s3988_s9  }
  0x48   :  { %3966 = dma.done.wait [#allocation3], 512  }
  0x49   :  { %3967 = vsyncadd [#allocation3], 4294966784 }
  0x4a   :  { %3968 = dma.done.wait [#allocation5], 16  }
  0x4b   :  { %3969 = vsyncadd [#allocation5], 4294967280 }
  0x4c   :  { %3970 = dma.done.wait [#allocation8], 16384  }
  0x4d   :  { %3971 = vsyncadd [#allocation8], 4294950912 }
  0x4e   :  { %3972 = dma.done.wait [#allocation11], 24576  }
  0x4f   :  { %3973 = vsyncadd [#allocation11], 4294942720 }
  0x50   :  { %110 = sfence }
  0x51   :  { %v4059_v0 = vld [vmem:[#allocation2] sm:$0xff]  ;;  %v4061_v1 = vld [vmem:[#allocation2 + $0x8] sm:$0xff]  ;;  %v4063_v2 = vld [vmem:[#allocation2 + $0x10] sm:$0xff]  ;;  %vm3991_vm0 = vmmov 0   ;;  %vm938_vm1 = vcmask 1043456   ;;  %vm922_vm3 = vcmask 64512  }
  0x52   :  { %v118_v3 = vmul.f32 %v4059_v0, %v4059_v0  ;;  %v119_v4 = vmul.f32 %v4061_v1, %v4061_v1  ;;  %v4069_v5 = vld [vmem:[#allocation2 + $0x18] sm:$0xff]  ;;  %v120_v6 = vmul.f32 %v4063_v2, %v4063_v2  ;;  %v3486_v8 = vld [vmem:[#allocation7 + $0x154] ss:$24 sps:$4 sm:$0xff]   ;;  %v3488_v9 = vld [vmem:[#allocation7 + $0x150] ss:$24 sps:$4 sm:$0xff]   ;;  %s3168_s17 = sld [smem:[#allocation6 + $0x1]] }
  0x53   :  { %v121_v7 = vmul.f32 %v4069_v5, %v4069_v5  ;;  %v3489_v11 = vld [vmem:[#allocation7 + $0x15c] ss:$24 sps:$4 sm:$0xff]   ;;  %v3491_v12 = vld [vmem:[#allocation7 + $0x158] ss:$24 sps:$4 sm:$0xff]   ;;  %732 = vmatprep.subr.bf16.mxu0 %v3486_v8  ;;  %v3495_v16 = vld [vmem:[#allocation7 + $0x12c] ss:$24 sps:$4 sm:$0xff]  }
  0x54   :  { %v122_v10 = vadd.f32 %v119_v4, %v118_v3  ;;  %v3492_v13 = vld [vmem:[#allocation7 + $0x124] ss:$24 sps:$4 sm:$0xff]   ;;  %733 = vmatpush1.bf16.msra.mxu0 %v3488_v9  ;;  %v3494_v15 = vld [vmem:[#allocation7 + $0x120] ss:$24 sps:$4 sm:$0xff]   ;;  %775 = vmatprep.subr.bf16.mxu1 %v3489_v11  ;;  %v3498_v18 = vld [vmem:[#allocation7 + $0xf4] ss:$24 sps:$4 sm:$0xff]  }
  0x55   :  { %v125_v14 = vadd.f32 %v121_v7, %v120_v6  ;;  %734 = vmatprep.subr.bf16.mxu0 %v3492_v13  ;;  %776 = vmatpush1.bf16.msra.mxu1 %v3491_v12  ;;  %v3497_v17 = vld [vmem:[#allocation7 + $0x128] ss:$24 sps:$4 sm:$0xff]   ;;  %v3501_v19 = vld [vmem:[#allocation7 + $0xfc] ss:$24 sps:$4 sm:$0xff]   ;;  %v3503_v22 = vld [vmem:[#allocation7 + $0xf8] ss:$24 sps:$4 sm:$0xff]  }
  0x56   :  { %123 = vadd.xlane.f32.xlu0 %v122_v10  ;;  %777 = vmatprep.subr.bf16.mxu1 %v3495_v16  ;;  %v3500_v20 = vld [vmem:[#allocation7 + $0xf0] ss:$24 sps:$4 sm:$0xff]   ;;  %v3504_v21 = vld [vmem:[#allocation7 + $0xc4] ss:$24 sps:$4 sm:$0xff]   ;;  %v3506_v24 = vld [vmem:[#allocation7 + $0xc0] ss:$24 sps:$4 sm:$0xff]  }
  0x57   :  { %v3507_v23 = vld [vmem:[#allocation7 + $0xcc] ss:$24 sps:$4 sm:$0xff]   ;;  %v3509_v26 = vld [vmem:[#allocation7 + $0xc8] ss:$24 sps:$4 sm:$0xff]   ;;  %v3513_v27 = vld [vmem:[#allocation7 + $0x9c] ss:$24 sps:$4 sm:$0xff]  }
  0x58   :  { %735 = vmatpush1.bf16.msra.mxu0 %v3494_v15  ;;  %v3510_v25 = vld [vmem:[#allocation7 + $0x94] ss:$24 sps:$4 sm:$0xff]   ;;  %v3512_v28 = vld [vmem:[#allocation7 + $0x90] ss:$24 sps:$4 sm:$0xff]   ;;  %v3516_v29 = vld [vmem:[#allocation7 + $0x64] ss:$24 sps:$4 sm:$0xff]  }
  0x59   :  { %736 = vmatprep.subr.bf16.mxu0 %v3498_v18  ;;  %778 = vmatpush1.bf16.msra.mxu1 %v3497_v17  ;;  %v3515_v30 = vld [vmem:[#allocation7 + $0x98] ss:$24 sps:$4 sm:$0xff]   ;;  %v3519_v31 = vld [vmem:[#allocation7 + $0x6c] ss:$24 sps:$4 sm:$0xff]   ;;  %v3521_v34 = vld [vmem:[#allocation7 + $0x68] ss:$24 sps:$4 sm:$0xff]  }
  0x5a   :  { %126 = vadd.xlane.f32.xlu0 %v125_v14  ;;  %779 = vmatprep.subr.bf16.mxu1 %v3501_v19  ;;  %v3518_v32 = vld [vmem:[#allocation7 + $0x60] ss:$24 sps:$4 sm:$0xff]   ;;  %v3522_v33 = vld [vmem:[#allocation7 + $0x34] ss:$24 sps:$4 sm:$0xff]   ;;  %v3524_v36 = vld [vmem:[#allocation7 + $0x30] ss:$24 sps:$4 sm:$0xff]  }
  0x5b   :  { %v3525_v35 = vld [vmem:[#allocation7 + $0x3c] ss:$24 sps:$4 sm:$0xff]   ;;  %v3527_v38 = vld [vmem:[#allocation7 + $0x38] ss:$24 sps:$4 sm:$0xff]   ;;  %v3531_v39 = vld [vmem:[#allocation7 + $0xc] ss:$24 sps:$4 sm:$0xff]  }
  0x5c   :  { %737 = vmatpush1.bf16.msra.mxu0 %v3500_v20  ;;  %v3528_v37 = vld [vmem:[#allocation7 + $0x4] ss:$24 sps:$4 sm:$0xff]   ;;  %v3530_v40 = vld [vmem:[#allocation7] ss:$24 sps:$4 sm:$0xff]   ;;  %v3534_v41 = vld [vmem:[#allocation7 + $0x2d4] ss:$24 sps:$4 sm:$0xff]  }
  0x5d   :  { %738 = vmatprep.subr.bf16.mxu0 %v3504_v21  ;;  %780 = vmatpush1.bf16.msra.mxu1 %v3503_v22  ;;  %v3533_v42 = vld [vmem:[#allocation7 + $0x8] ss:$24 sps:$4 sm:$0xff]   ;;  %v3537_v43 = vld [vmem:[#allocation7 + $0x2dc] ss:$24 sps:$4 sm:$0xff]   ;;  %v3539_v46 = vld [vmem:[#allocation7 + $0x2d8] ss:$24 sps:$4 sm:$0xff]   ;;  %v140_v21 = vlaneseq }
  0x5e   :  { %781 = vmatprep.subr.bf16.mxu1 %v3507_v23  ;;  %v3536_v44 = vld [vmem:[#allocation7 + $0x2d0] ss:$24 sps:$4 sm:$0xff]   ;;  %v3540_v45 = vld [vmem:[#allocation7 + $0x2a4] ss:$24 sps:$4 sm:$0xff]   ;;  %v3542_v48 = vld [vmem:[#allocation7 + $0x2a0] ss:$24 sps:$4 sm:$0xff]  }
  0x5f   :  { %v3543_v47 = vld [vmem:[#allocation7 + $0x2ac] ss:$24 sps:$4 sm:$0xff]   ;;  %v3545_v50 = vld [vmem:[#allocation7 + $0x2a8] ss:$24 sps:$4 sm:$0xff]   ;;  %v3549_v51 = vld [vmem:[#allocation7 + $0x27c] ss:$24 sps:$4 sm:$0xff]  }
  0x60   :  { %739 = vmatpush1.bf16.msra.mxu0 %v3506_v24  ;;  %v3546_v49 = vld [vmem:[#allocation7 + $0x274] ss:$24 sps:$4 sm:$0xff]   ;;  %v3548_v52 = vld [vmem:[#allocation7 + $0x270] ss:$24 sps:$4 sm:$0xff]   ;;  %v3552_v53 = vld [vmem:[#allocation7 + $0x244] ss:$24 sps:$4 sm:$0xff]  }
  0x61   :  { %740 = vmatprep.subr.bf16.mxu0 %v3510_v25  ;;  %782 = vmatpush1.bf16.msra.mxu1 %v3509_v26  ;;  %v3551_v54 = vld [vmem:[#allocation7 + $0x278] ss:$24 sps:$4 sm:$0xff]   ;;  %v3555_v55 = vld [vmem:[#allocation7 + $0x24c] ss:$24 sps:$4 sm:$0xff]   ;;  %v3557_v57 = vld [vmem:[#allocation7 + $0x248] ss:$24 sps:$4 sm:$0xff]  }
  0x62   :  { %783 = vmatprep.subr.bf16.mxu1 %v3513_v27  ;;  %v3554_v56 = vld [vmem:[#allocation7 + $0x240] ss:$24 sps:$4 sm:$0xff]   ;;  %v3558_v58 = vld [vmem:[#allocation7 + $0x214] ss:$24 sps:$4 sm:$0xff]   ;;  %v3560_v60 = vld [vmem:[#allocation7 + $0x210] ss:$24 sps:$4 sm:$0xff]  }
  0x63   :  { %v3561_v59 = vld [vmem:[#allocation7 + $0x21c] ss:$24 sps:$4 sm:$0xff]   ;;  %v3563_v61 = vld [vmem:[#allocation7 + $0x218] ss:$24 sps:$4 sm:$0xff]   ;;  %v3567_v63 = vld [vmem:[#allocation7 + $0x1ec] ss:$24 sps:$4 sm:$0xff]  }
  0x64   :  { %741 = vmatpush1.bf16.msra.mxu0 %v3512_v28  ;;  %v3564_v62 = vld [vmem:[#allocation7 + $0x1e4] ss:$24 sps:$4 sm:$0xff]   ;;  %v3566_v3 = vld [vmem:[#allocation7 + $0x1e0] ss:$24 sps:$4 sm:$0xff]   ;;  %v3570_v6 = vld [vmem:[#allocation7 + $0x1b4] ss:$24 sps:$4 sm:$0xff]  }
  0x65   :  { %742 = vmatprep.subr.bf16.mxu0 %v3516_v29  ;;  %784 = vmatpush1.bf16.msra.mxu1 %v3515_v30  ;;  %v3569_v4 = vld [vmem:[#allocation7 + $0x1e8] ss:$24 sps:$4 sm:$0xff]   ;;  %v3573_v7 = vld [vmem:[#allocation7 + $0x1bc] ss:$24 sps:$4 sm:$0xff]   ;;  %v3575_v9 = vld [vmem:[#allocation7 + $0x1b8] ss:$24 sps:$4 sm:$0xff]  }
  0x66   :  { %785 = vmatprep.subr.bf16.mxu1 %v3519_v31  ;;  %v3572_v8 = vld [vmem:[#allocation7 + $0x1b0] ss:$24 sps:$4 sm:$0xff]   ;;  %v3576_v10 = vld [vmem:[#allocation7 + $0x184] ss:$24 sps:$4 sm:$0xff]   ;;  %v3578_v12 = vld [vmem:[#allocation7 + $0x180] ss:$24 sps:$4 sm:$0xff]  }
  0x67   :  { %v3579_v11 = vld [vmem:[#allocation7 + $0x18c] ss:$24 sps:$4 sm:$0xff]   ;;  %v3581_v13 = vld [vmem:[#allocation7 + $0x188] ss:$24 sps:$4 sm:$0xff]   ;;  %v4076_v22 = vshrl.u32 %v140_v21, 7 }
  0x68   :  { %743 = vmatpush1.bf16.msra.mxu0 %v3518_v32  ;;  %v3584_v14 = vld [vmem:[#allocation7 + $0x164] ss:$24 sps:$4 sm:$0xff]   ;;  %v116_v26 = vld [vmem:[%s4245_s2] sm:$0x3]  ;;  %s868_s2 = sld [smem:[#allocation6]] }
  0x69   :  { %744 = vmatprep.subr.bf16.mxu0 %v3522_v33  ;;  %786 = vmatpush1.bf16.msra.mxu1 %v3521_v34  ;;  %v146_v23 = vsub.s32 1, %v4076_v22  ;;  %v142_v24 = vsub.s32 0, %v4076_v22 }
  0x6a   :  { %787 = vmatprep.subr.bf16.mxu1 %v3525_v35 }
  0x6b   :  { %v147_v28 = vrot.slane %v116_v26, %v146_v23  ;;  %v143_v30 = vrot.slane %v116_v26, %v142_v24 }
  0x6c   :  { %745 = vmatpush1.bf16.msra.mxu0 %v3524_v36 }
  0x6d   :  { %746 = vmatprep.subr.bf16.mxu0 %v3528_v37  ;;  %788 = vmatpush1.bf16.msra.mxu1 %v3527_v38 }
  0x6e   :  { %789 = vmatprep.subr.bf16.mxu1 %v3531_v39  ;;  %v3582_v39 = vld [vmem:[#allocation7 + $0x160] ss:$24 sps:$4 sm:$0xff]  }
  0x70   :  { %747 = vmatpush1.bf16.msra.mxu0 %v3530_v40  ;;  %v3587_v40 = vld [vmem:[#allocation7 + $0x134] ss:$24 sps:$4 sm:$0xff]  }
  0x71   :  { %748 = vmatprep.subr.bf16.mxu0 %v3534_v41  ;;  %790 = vmatpush1.bf16.msra.mxu1 %v3533_v42  ;;  %v3593_v41 = vld [vmem:[#allocation7 + $0xd4] ss:$24 sps:$4 sm:$0xff]   ;;  %v3591_v42 = vld [vmem:[#allocation7 + $0xd0] ss:$24 sps:$4 sm:$0xff]  }
  0x72   :  { %791 = vmatprep.subr.bf16.mxu1 %v3537_v43  ;;  %v3596_v43 = vld [vmem:[#allocation7 + $0xa4] ss:$24 sps:$4 sm:$0xff]  }
  0x74   :  { %749 = vmatpush2.bf16.msra.mxu0 %v3536_v44  ;;  %v3594_v44 = vld [vmem:[#allocation7 + $0xa0] ss:$24 sps:$4 sm:$0xff]  }
  0x75   :  { %750 = vmatprep.subr.bf16.mxu0 %v3540_v45  ;;  %792 = vmatpush2.bf16.msra.mxu1 %v3539_v46  ;;  %v3599_v45 = vld [vmem:[#allocation7 + $0x74] ss:$24 sps:$4 sm:$0xff]   ;;  %v3597_v46 = vld [vmem:[#allocation7 + $0x70] ss:$24 sps:$4 sm:$0xff]  }
  0x76   :  { %793 = vmatprep.subr.bf16.mxu1 %v3543_v47  ;;  %v3602_v47 = vld [vmem:[#allocation7 + $0x44] ss:$24 sps:$4 sm:$0xff]  }
  0x78   :  { %751 = vmatpush2.bf16.msra.mxu0 %v3542_v48  ;;  %v3600_v48 = vld [vmem:[#allocation7 + $0x40] ss:$24 sps:$4 sm:$0xff]  }
  0x79   :  { %752 = vmatprep.subr.bf16.mxu0 %v3546_v49  ;;  %794 = vmatpush2.bf16.msra.mxu1 %v3545_v50  ;;  %v3605_v49 = vld [vmem:[#allocation7 + $0x14] ss:$24 sps:$4 sm:$0xff]   ;;  %v3603_v50 = vld [vmem:[#allocation7 + $0x10] ss:$24 sps:$4 sm:$0xff]  }
  0x7a   :  { %795 = vmatprep.subr.bf16.mxu1 %v3549_v51  ;;  %v3608_v51 = vld [vmem:[#allocation7 + $0x2e4] ss:$24 sps:$4 sm:$0xff]  }
  0x7c   :  { %753 = vmatpush2.bf16.msra.mxu0 %v3548_v52  ;;  %v3606_v52 = vld [vmem:[#allocation7 + $0x2e0] ss:$24 sps:$4 sm:$0xff]  }
  0x7d   :  { %754 = vmatprep.subr.bf16.mxu0 %v3552_v53  ;;  %796 = vmatpush2.bf16.msra.mxu1 %v3551_v54  ;;  %v3611_v53 = vld [vmem:[#allocation7 + $0x2b4] ss:$24 sps:$4 sm:$0xff]   ;;  %v3609_v54 = vld [vmem:[#allocation7 + $0x2b0] ss:$24 sps:$4 sm:$0xff]  }
  0x7e   :  { %797 = vmatprep.subr.bf16.mxu1 %v3555_v55  ;;  %v3614_v55 = vld [vmem:[#allocation7 + $0x284] ss:$24 sps:$4 sm:$0xff]  }
  0x80   :  { %755 = vmatpush2.bf16.msra.mxu0 %v3554_v56  ;;  %v3612_v56 = vld [vmem:[#allocation7 + $0x280] ss:$24 sps:$4 sm:$0xff]  }
  0x81   :  { %756 = vmatprep.subr.bf16.mxu0 %v3558_v58  ;;  %798 = vmatpush2.bf16.msra.mxu1 %v3557_v57  ;;  %v3617_v57 = vld [vmem:[#allocation7 + $0x254] ss:$24 sps:$4 sm:$0xff]   ;;  %v3615_v58 = vld [vmem:[#allocation7 + $0x250] ss:$24 sps:$4 sm:$0xff]  }
  0x82   :  { %799 = vmatprep.subr.bf16.mxu1 %v3561_v59  ;;  %v3620_v59 = vld [vmem:[#allocation7 + $0x224] ss:$24 sps:$4 sm:$0xff]  }
  0x84   :  { %757 = vmatpush2.bf16.msra.mxu0 %v3560_v60  ;;  %v3618_v60 = vld [vmem:[#allocation7 + $0x220] ss:$24 sps:$4 sm:$0xff]  }
  0x85   :  { %758 = vmatprep.subr.bf16.mxu0 %v3564_v62  ;;  %800 = vmatpush2.bf16.msra.mxu1 %v3563_v61  ;;  %v3623_v61 = vld [vmem:[#allocation7 + $0x1f4] ss:$24 sps:$4 sm:$0xff]   ;;  %v3621_v62 = vld [vmem:[#allocation7 + $0x1f0] ss:$24 sps:$4 sm:$0xff]  }
  0x86   :  { %801 = vmatprep.subr.bf16.mxu1 %v3567_v63  ;;  %v3626_v63 = vld [vmem:[#allocation7 + $0x1c4] ss:$24 sps:$4 sm:$0xff]  }
  0x88   :  { %759 = vmatpush2.bf16.msra.mxu0 %v3566_v3  ;;  %v3624_v3 = vld [vmem:[#allocation7 + $0x1c0] ss:$24 sps:$4 sm:$0xff]  }
  0x89   :  { %760 = vmatprep.subr.bf16.mxu0 %v3570_v6  ;;  %802 = vmatpush2.bf16.msra.mxu1 %v3569_v4  ;;  %v3629_v4 = vld [vmem:[#allocation7 + $0x194] ss:$24 sps:$4 sm:$0xff]   ;;  %v3627_v6 = vld [vmem:[#allocation7 + $0x190] ss:$24 sps:$4 sm:$0xff]  }
  0x8a   :  { %803 = vmatprep.subr.bf16.mxu1 %v3573_v7  ;;  %v3990_v7 = vmov 0.0  }
  0x8c   :  { %761 = vmatpush2.bf16.msra.mxu0 %v3572_v8 }
  0x8d   :  { %762 = vmatprep.subr.bf16.mxu0 %v3576_v10  ;;  %804 = vmatpush2.bf16.msra.mxu1 %v3575_v9 }
  0x8e   :  { %805 = vmatprep.subr.bf16.mxu1 %v3579_v11 }
  0x90   :  { %763 = vmatpush2.bf16.msra.mxu0 %v3578_v12 }
  0x91   :  { %818 = vmatprep.subr.bf16.mxu0 %v3584_v14  ;;  %806 = vmatpush2.bf16.msra.mxu1 %v3581_v13 }
  0x92   :  { %3421 = vmatprep.subr.bf16.mxu1 %v3990_v7 }
  0xdf   :  { %v124_v15 = vpop.xlane.xlu0 %123 }
  0xe0   :  { %v129_v16 = vmul.f32 0.00390625, %v124_v15 }
  0xe2   :  { %v131_v17 = vadd.f32 1e-06, %v129_v16 }
  0xe3   :  { %v127_v18 = vpop.xlane.xlu0 %126 }
  0xe4   :  { %3774 = vrsqrt.f32 %v131_v17  ;;  %v130_v19 = vmul.f32 0.00390625, %v127_v18  ;;  %v4109_v18 = vand.u32 127, %v140_v21 }
  0xe6   :  { %v132_v20 = vadd.f32 1e-06, %v130_v19  ;;  %v865_v19 = vsub.s32 %v4109_v18, %v4076_v22  ;;  %vm867_vm2 = vcmp.gt.s32.totalorder %v4109_v18, %v4076_v22  ;;  %v3635_v18 = vld [vmem:[#allocation9 + $0x64] ss:$8 sps:$4 sm:$0xff]  }
  0xe8   :  { %3776 = vrsqrt.f32 %v132_v20 }
  0xf1   :  { %v3775_v25 = vpop.eup %3774 }
  0xf2   :  { %v136_v27 = vmul.f32 %v3775_v25, %v4061_v1  ;;  %v135_v29 = vmul.f32 %v3775_v25, %v4059_v0  ;;  %v3585_v0 = vld [vmem:[#allocation7 + $0x130] ss:$24 sps:$4 sm:$0xff]   ;;  %v866_v25 = vcvt.s32.f32 %v865_v19 }
  0xf4   :  { %v151_v34 = vmul.f32 %v147_v28, %v136_v27  ;;  %v150_v36 = vmul.f32 %v143_v30, %v135_v29  ;;  %v869_v27 = vstv %s868_s2 }
  0xf5   :  { %v3777_v31 = vpop.eup %3776 }
  0xf6   :  { %v138_v32 = vmul.f32 %v3777_v31, %v4069_v5  ;;  %v137_v33 = vmul.f32 %v3777_v31, %v4063_v2  ;;  %v3590_v2 = vld [vmem:[#allocation7 + $0x104] ss:$24 sps:$4 sm:$0xff]   ;;  %v3588_v5 = vld [vmem:[#allocation7 + $0x100] ss:$24 sps:$4 sm:$0xff]  }
  0xf8   :  { %v153_v35 = vmul.f32 %v147_v28, %v138_v32  ;;  %v152_v37 = vmul.f32 %v143_v30, %v137_v33  ;;  %v4115_v28 = vmul.f32 %v869_v27, %v866_v25 }
  0xfa   :  { %v155_v38 = vpack.c.bf16 %v153_v35, %v151_v34  ;;  %v4091_v1 = vpack.c.bf16 %v152_v37, %v150_v36 }
  0xfc   :  { %764 = vmatprep.mubr.bf16.mxu0 %v155_v38  ;;  %807 = vmatprep.mubr.bf16.mxu1 %v155_v38 }
  0xfd   :  { %765 = vmatmul.mubr.bf16.vlgmr.msra.gmra.mxu0 %v4091_v1  ;;  %808 = vmatmul.mubr.bf16.vlgmr.msra.gmra.mxu1 %v4091_v1 }
  0xfe   :  { %819 = vmatpush1.bf16.msra.mxu0 %v3582_v39  ;;  %850 = vmatprep.mubr.bf16.mxu0 %v155_v38 }
  0xff   :  { %820 = vmatprep.subr.bf16.mxu0 %v3587_v40  ;;  %3423 = vmatprep.mubr.msk.bf16.mxu1 %vm3991_vm0, %v3990_v7 }
 0x102   :  { %821 = vmatpush1.bf16.msra.mxu0 %v3585_v0 }
 0x103   :  { %822 = vmatprep.subr.bf16.mxu0 %v3590_v2 }
 0x106   :  { %823 = vmatpush1.bf16.msra.mxu0 %v3588_v5 }
 0x107   :  { %824 = vmatprep.subr.bf16.mxu0 %v3593_v41 }
 0x10a   :  { %825 = vmatpush1.bf16.msra.mxu0 %v3591_v42 }
 0x10b   :  { %826 = vmatprep.subr.bf16.mxu0 %v3596_v43 }
 0x10e   :  { %827 = vmatpush1.bf16.msra.mxu0 %v3594_v44 }
 0x10f   :  { %828 = vmatprep.subr.bf16.mxu0 %v3599_v45 }
 0x112   :  { %829 = vmatpush1.bf16.msra.mxu0 %v3597_v46 }
 0x113   :  { %830 = vmatprep.subr.bf16.mxu0 %v3602_v47 }
 0x116   :  { %831 = vmatpush1.bf16.msra.mxu0 %v3600_v48 }
 0x117   :  { %832 = vmatprep.subr.bf16.mxu0 %v3605_v49  ;;  %v872_v49 = vstv %s3168_s17 }
 0x11a   :  { %833 = vmatpush1.bf16.msra.mxu0 %v3603_v50 }
 0x11b   :  { %834 = vmatprep.subr.bf16.mxu0 %v3608_v51  ;;  %v4137_v51 = vmul.f32 %v872_v49, %v866_v25 }
 0x11e   :  { %835 = vmatpush2.bf16.msra.mxu0 %v3606_v52 }
 0x11f   :  { %836 = vmatprep.subr.bf16.mxu0 %v3611_v53 }
 0x122   :  { %837 = vmatpush2.bf16.msra.mxu0 %v3609_v54 }
 0x123   :  { %838 = vmatprep.subr.bf16.mxu0 %v3614_v55 }
 0x126   :  { %839 = vmatpush2.bf16.msra.mxu0 %v3612_v56 }
 0x127   :  { %840 = vmatprep.subr.bf16.mxu0 %v3617_v57 }
 0x12a   :  { %841 = vmatpush2.bf16.msra.mxu0 %v3615_v58 }
 0x12b   :  { %842 = vmatprep.subr.bf16.mxu0 %v3620_v59 }
 0x12e   :  { %843 = vmatpush2.bf16.msra.mxu0 %v3618_v60 }
 0x12f   :  { %844 = vmatprep.subr.bf16.mxu0 %v3623_v61 }
 0x132   :  { %845 = vmatpush2.bf16.msra.mxu0 %v3621_v62 }
 0x133   :  { %846 = vmatprep.subr.bf16.mxu0 %v3626_v63 }
 0x136   :  { %847 = vmatpush2.bf16.msra.mxu0 %v3624_v3 }
 0x137   :  { %848 = vmatprep.subr.bf16.mxu0 %v3629_v4 }
 0x13a   :  { %849 = vmatpush2.bf16.msra.mxu0 %v3627_v6 }
 0x13d   :  { %851 = vmatmul.mubr.bf16.vlgmr.msra.gmra.mxu0 %v4091_v1 }
 0x1bd   :  { %v809_v8 = vpop.f32.mrf.mxu1  ;;  %v766_v10 = vpop.f32.mrf.mxu0 }
 0x1be   :  { %v876_v9 = vpack.c.bf16 %v809_v8, %v809_v8  ;;  %v874_v11 = vpack.c.bf16 %v766_v10, %v766_v10 }
 0x1bf   :  { %v768_v12 = vpop.f32.mrf.mxu0  ;;  %v811_v20 = vpop.f32.mrf.mxu1 }
 0x1c0   :  { %3422 = vmatpush3.bf16.xpose.msra.mxu1 %v876_v9  ;;  %v877_v42 = vpack.c.bf16 %v811_v20, %v811_v20  ;;  %v875_v45 = vpack.c.bf16 %v768_v12, %v768_v12 }
 0x1c1   :  { %3427 = vmatprep.subr.bf16.mxu1 %v3990_v7  ;;  %v4102_v13 = vpop.f32.mrf.mxu0  ;;  %v4113_v26 = vpop.f32.mrf.mxu1 }
 0x1c3   :  { %v4104_v14 = vpop.f32.mrf.mxu0  ;;  %v4117_v29 = vpop.f32.mrf.mxu1 }
 0x1c7   :  { %3424 = vmatmul.mubr.bf16.vlgmr.msra.gmra.mxu1 %v874_v11  ;;  %v1084_v11 = vpack.c.bf16 %v4113_v26, %v4113_v26 }
 0x1c8   :  { %3429 = vmatprep.mubr.msk.bf16.mxu1 %vm3991_vm0, %v3990_v7 }
 0x1fd   :  { %v852_v15 = vpop.f32.mrf.mxu0 }
 0x1fe   :  { %v878_v16 = vpack.c.bf16 %v852_v15, %v852_v15 }
 0x1ff   :  { %v854_v43 = vpop.f32.mrf.mxu0 }
 0x200   :  { %v940_v17 = vsel %vm938_vm1, %v878_v16, 0  ;;  %v879_v44 = vpack.c.bf16 %v854_v43, %v854_v43  ;;  %v1082_v16 = vpack.c.bf16 %v4102_v13, %v4102_v13 }
 0x201   :  { %3428 = vmatpush3.bf16.msra.mxu1 %v940_v17  ;;  %v856_v12 = vpop.f32.mrf.mxu0 }
 0x202   :  { %3433 = vmatprep.subr.bf16.mxu1 %v3990_v7  ;;  %v1040_v46 = vsel %vm938_vm1, %v879_v44, 0  ;;  %v1086_v15 = vpack.c.bf16 %v856_v12, %v856_v12  ;;  %v3648_v12 = vld [vmem:[#allocation9 + $0x10] ss:$8 sps:$4 sm:$0xff]  }
 0x204   :  { %v1146_v17 = vsel %vm938_vm1, %v1086_v15, 0  ;;  %v3653_v15 = vld [vmem:[#allocation9 + $0x4] ss:$8 sps:$4 sm:$0xff]  }
 0x287   :  { %v914_v30 = vpop.f32.mrf.mxu1 }
 0x288   :  { %v915_v21 = vadd.f32 %v914_v30, %v4115_v28 }
 0x289   :  { %v3425_v31 = vpop.f32.mrf.mxu1 }
 0x28a   :  { %v920_v32 = vsel %vm867_vm2, -3.4028235e+38, %v915_v21 }
 0x28b   :  { %v917_v33 = vpop.f32.mrf.mxu1  ;;  %v921_v34 = vmax.f32 %v920_v32, -3.4028235e+38 }
 0x28d   :  { %v3426_v35 = vpop.f32.mrf.mxu1  ;;  %v923_v36 = vsel %vm922_vm3, %v921_v34, -inf }
 0x28e   :  { %924 = vmax.xlane.f32.xlu1 %v923_v36 }
 0x317   :  { %v925_v37 = vpop.xlane.xlu1 %924 }
 0x318   :  { %v926_v38 = vsub.f32 %v921_v34, %v925_v37 }
 0x31a   :  { %v927_v39 = vmul.f32 1.442695, %v926_v38 }
 0x31c   :  { %3778 = vpow2.f32 %v927_v39 }
 0x329   :  { %v3779_v1 = vpop.eup %3778 }
 0x32a   :  { %v929_v40 = vsel %vm922_vm3, %v3779_v1, 0.0 }
 0x32b   :  { %930 = vadd.xlane.f32.xlu1 %v929_v40 }
 0x3b4   :  { %v931_v0 = vpop.xlane.xlu1 %930 }
 0x3b5   :  { %3780 = vrcp.f32 %v931_v0 }
 0x3c2   :  { %v3781_v2 = vpop.eup %3780 }
 0x3c3   :  { %v933_v5 = vmul.f32 %v3781_v2, %v3779_v1  ;;  %v1085_v2 = vpack.c.bf16 %v4117_v29, %v4117_v29 }
 0x3c5   :  { %v934_v41 = vpack.c.bf16 %v933_v5, %v933_v5  ;;  %v858_v5 = vpop.f32.mrf.mxu0 }
 0x3c7   :  { %3430 = vmatmul.mubr.msk.bf16.vlgmr.msra.gmra.mxu1 %vm922_vm3, %v934_v41  ;;  %v1087_v41 = vpack.c.bf16 %v858_v5, %v858_v5 }
 0x3c8   :  { %3434 = vmatpush3.bf16.xpose.msra.mxu1 %v877_v42  ;;  %3435 = vmatprep.mubr.msk.bf16.mxu1 %vm3991_vm0, %v3990_v7  ;;  %v1083_v42 = vpack.c.bf16 %v4104_v14, %v4104_v14 }
 0x3c9   :  { %3439 = vmatprep.subr.bf16.mxu1 %v3990_v7  ;;  %v1246_v43 = vsel %vm938_vm1, %v1087_v41, 0 }
 0x3cf   :  { %3436 = vmatmul.mubr.bf16.vlgmr.msra.gmra.mxu1 %v875_v45 }
 0x3d0   :  { %3440 = vmatpush3.bf16.msra.mxu1 %v1040_v46  ;;  %3441 = vmatprep.mubr.msk.bf16.mxu1 %vm3991_vm0, %v3990_v7 }
 0x3d1   :  { %3445 = vmatprep.subr.bf16.mxu1 %v3990_v7 }
 0x487   :  { %v4135_v47 = vpop.f32.mrf.mxu1 }
 0x489   :  { %v3431_v48 = vpop.f32.mrf.mxu1 }
 0x48b   :  { %v979_v50 = vpop.f32.mrf.mxu1 }
 0x48d   :  { %v3432_v52 = vpop.f32.mrf.mxu1 }
 0x48f   :  { %v1016_v53 = vpop.f32.mrf.mxu1 }
 0x490   :  { %v1017_v54 = vadd.f32 %v1016_v53, %v4137_v51 }
 0x491   :  { %v3437_v55 = vpop.f32.mrf.mxu1 }
 0x492   :  { %v1022_v56 = vsel %vm867_vm2, -3.4028235e+38, %v1017_v54 }
 0x493   :  { %v1019_v57 = vpop.f32.mrf.mxu1  ;;  %v1023_v58 = vmax.f32 %v1022_v56, -3.4028235e+38 }
 0x495   :  { %v3438_v59 = vpop.f32.mrf.mxu1  ;;  %v1024_v60 = vsel %vm922_vm3, %v1023_v58, -inf }
 0x496   :  { %1025 = vmax.xlane.f32.xlu0 %v1024_v60  ;;  %v3630_v59 = vld [vmem:[#allocation9 + $0x70] ss:$8 sps:$4 sm:$0xff]   ;;  %v3632_v60 = vld [vmem:[#allocation9 + $0x74] ss:$8 sps:$4 sm:$0xff]  }
 0x497   :  { %1482 = vmatprep.subr.bf16.mxu0 %v3632_v60 }
 0x498   :  { %1483 = vmatpush1.bf16.msra.mxu0 %v3630_v59 }
 0x499   :  { %1484 = vmatprep.subr.bf16.mxu0 %v3635_v18 }
 0x51f   :  { %v1026_v61 = vpop.xlane.xlu0 %1025 }
 0x520   :  { %v1027_v62 = vsub.f32 %v1023_v58, %v1026_v61  ;;  %v3633_v61 = vld [vmem:[#allocation9 + $0x60] ss:$8 sps:$4 sm:$0xff]  }
 0x521   :  { %1485 = vmatpush1.bf16.msra.mxu0 %v3633_v61  ;;  %v1598_v61 = vld [vmem:[#allocation10 + $0x100] sm:$0xff] }
 0x522   :  { %v1028_v63 = vmul.f32 1.442695, %v1027_v62  ;;  %v3638_v62 = vld [vmem:[#allocation9 + $0x54] ss:$8 sps:$4 sm:$0xff]  }
 0x523   :  { %1486 = vmatprep.subr.bf16.mxu0 %v3638_v62  ;;  %v1602_v62 = vld [vmem:[#allocation10 + $0x120] sm:$0xff] }
 0x524   :  { %3782 = vpow2.f32 %v1028_v63  ;;  %v3636_v63 = vld [vmem:[#allocation9 + $0x50] ss:$8 sps:$4 sm:$0xff]  }
 0x525   :  { %1487 = vmatpush1.bf16.msra.mxu0 %v3636_v63  ;;  %v1599_v63 = vld [vmem:[#allocation10 + $0x108] sm:$0xff] }
 0x531   :  { %v3783_v3 = vpop.eup %3782 }
 0x532   :  { %v1030_v4 = vsel %vm922_vm3, %v3783_v3, 0.0 }
 0x533   :  { %1031 = vadd.xlane.f32.xlu1 %v1030_v4  ;;  %v3639_v4 = vld [vmem:[#allocation9 + $0x40] ss:$8 sps:$4 sm:$0xff]  }
 0x5bc   :  { %v1032_v6 = vpop.xlane.xlu1 %1031 }
 0x5bd   :  { %3784 = vrcp.f32 %v1032_v6  ;;  %v3644_v6 = vld [vmem:[#allocation9 + $0x34] ss:$8 sps:$4 sm:$0xff]  }
 0x5ca   :  { %v3785_v8 = vpop.eup %3784 }
 0x5cb   :  { %v1034_v9 = vmul.f32 %v3785_v8, %v3783_v3  ;;  %v3641_v3 = vld [vmem:[#allocation9 + $0x44] ss:$8 sps:$4 sm:$0xff]   ;;  %v3642_v8 = vld [vmem:[#allocation9 + $0x30] ss:$8 sps:$4 sm:$0xff]  }
 0x5cc   :  { %1488 = vmatprep.subr.bf16.mxu0 %v3641_v3  ;;  %v1603_v3 = vld [vmem:[#allocation10 + $0x128] sm:$0xff] }
 0x5cd   :  { %v1035_v10 = vpack.c.bf16 %v1034_v9, %v1034_v9  ;;  %1489 = vmatpush1.bf16.msra.mxu0 %v3639_v4  ;;  %v3647_v9 = vld [vmem:[#allocation9 + $0x24] ss:$8 sps:$4 sm:$0xff]  }
 0x5ce   :  { %1490 = vmatprep.subr.bf16.mxu0 %v3644_v6 }
 0x5cf   :  { %3442 = vmatmul.mubr.msk.bf16.vlgmr.msra.gmra.mxu1 %vm922_vm3, %v1035_v10  ;;  %v3645_v10 = vld [vmem:[#allocation9 + $0x20] ss:$8 sps:$4 sm:$0xff]  }
 0x5d0   :  { %3446 = vmatpush3.bf16.xpose.msra.mxu1 %v1084_v11  ;;  %3447 = vmatprep.mubr.msk.bf16.mxu1 %vm3991_vm0, %v3990_v7  ;;  %v3650_v11 = vld [vmem:[#allocation9 + $0x14] ss:$8 sps:$4 sm:$0xff]  }
 0x5d1   :  { %3451 = vmatprep.subr.bf16.mxu1 %v3990_v7  ;;  %1491 = vmatpush1.bf16.msra.mxu0 %v3642_v8  ;;  %v3238_v8 = vcombine.high %v1598_v61, %v1602_v62 }
 0x5d2   :  { %1492 = vmatprep.subr.bf16.mxu0 %v3647_v9  ;;  %v3240_v9 = vcombine.high %v1599_v63, %v1603_v3 }
 0x5d5   :  { %1493 = vmatpush1.bf16.msra.mxu0 %v3645_v10  ;;  %v1590_v10 = vld [vmem:[#allocation10 + $0xc0] sm:$0xff] }
 0x5d6   :  { %1494 = vmatprep.subr.bf16.mxu0 %v3650_v11  ;;  %v1594_v11 = vld [vmem:[#allocation10 + $0xe0] sm:$0xff] }
 0x5d7   :  { %3448 = vmatmul.mubr.bf16.vlgmr.msra.gmra.mxu1 %v1082_v16  ;;  %v3651_v16 = vld [vmem:[#allocation9] ss:$8 sps:$4 sm:$0xff]  }
 0x5d8   :  { %3452 = vmatpush3.bf16.msra.mxu1 %v1146_v17  ;;  %3453 = vmatprep.mubr.msk.bf16.mxu1 %vm3991_vm0, %v3990_v7  ;;  %v3656_v17 = vld [vmem:[#allocation9 + $0xf4] ss:$8 sps:$4 sm:$0xff]  }
 0x5d9   :  { %3457 = vmatprep.subr.bf16.mxu1 %v3990_v7  ;;  %1495 = vmatpush1.bf16.msra.mxu0 %v3648_v12  ;;  %v1591_v12 = vld [vmem:[#allocation10 + $0xc8] sm:$0xff] }
 0x5da   :  { %1496 = vmatprep.subr.bf16.mxu0 %v3653_v15  ;;  %v1595_v15 = vld [vmem:[#allocation10 + $0xe8] sm:$0xff] }
 0x5dd   :  { %1497 = vmatpush1.bf16.msra.mxu0 %v3651_v16  ;;  %v3237_v16 = vcombine.low %v1598_v61, %v1602_v62  ;;  %v3833_v62 = vld [vmem:[#allocation2 + $0x18] sm:$0xff] }
 0x5de   :  { %1498 = vmatprep.subr.bf16.mxu0 %v3656_v17  ;;  %v3239_v17 = vcombine.low %v1599_v63, %v1603_v3 }
 0x68f   :  { %v4157_v19 = vpop.f32.mrf.mxu1 }
 0x691   :  { %v3443_v20 = vpop.f32.mrf.mxu1 }
 0x692   :  { %v3654_v20 = vld [vmem:[#allocation9 + $0xf0] ss:$8 sps:$4 sm:$0xff]  }
 0x693   :  { %v1079_v25 = vpop.f32.mrf.mxu1  ;;  %1499 = vmatpush2.bf16.msra.mxu0 %v3654_v20  ;;  %v3230_v20 = vcombine.high %v1590_v10, %v1594_v11 }
 0x694   :  { %v3659_v25 = vld [vmem:[#allocation9 + $0xe4] ss:$8 sps:$4 sm:$0xff]  }
 0x695   :  { %v3444_v26 = vpop.f32.mrf.mxu1  ;;  %1500 = vmatprep.subr.bf16.mxu0 %v3659_v25  ;;  %v3232_v25 = vcombine.high %v1591_v12, %v1595_v15 }
 0x696   :  { %v3657_v26 = vld [vmem:[#allocation9 + $0xe0] ss:$8 sps:$4 sm:$0xff]  }
 0x697   :  { %v1122_v27 = vpop.f32.mrf.mxu1  ;;  %1501 = vmatpush2.bf16.msra.mxu0 %v3657_v26  ;;  %v1582_v26 = vld [vmem:[#allocation10 + $0x80] sm:$0xff] }
 0x698   :  { %v1123_v30 = vadd.f32 %v1122_v27, %v4115_v28  ;;  %v3662_v27 = vld [vmem:[#allocation9 + $0xd4] ss:$8 sps:$4 sm:$0xff]  }
 0x699   :  { %v3449_v21 = vpop.f32.mrf.mxu1  ;;  %1502 = vmatprep.subr.bf16.mxu0 %v3662_v27  ;;  %v1586_v27 = vld [vmem:[#allocation10 + $0xa0] sm:$0xff] }
 0x69a   :  { %v1128_v13 = vsel %vm867_vm2, -3.4028235e+38, %v1123_v30  ;;  %v3660_v30 = vld [vmem:[#allocation9 + $0xd0] ss:$8 sps:$4 sm:$0xff]   ;;  %v3665_v21 = vld [vmem:[#allocation9 + $0xc4] ss:$8 sps:$4 sm:$0xff]  }
 0x69b   :  { %v1125_v31 = vpop.f32.mrf.mxu1  ;;  %v1129_v32 = vmax.f32 %v1128_v13, -3.4028235e+38  ;;  %1503 = vmatpush2.bf16.msra.mxu0 %v3660_v30  ;;  %v3663_v13 = vld [vmem:[#allocation9 + $0xc0] ss:$8 sps:$4 sm:$0xff]  }
 0x69c   :  { %1504 = vmatprep.subr.bf16.mxu0 %v3665_v21  ;;  %v3668_v31 = vld [vmem:[#allocation9 + $0xb4] ss:$8 sps:$4 sm:$0xff]   ;;  %v1583_v30 = vld [vmem:[#allocation10 + $0x88] sm:$0xff] }
 0x69d   :  { %v3450_v33 = vpop.f32.mrf.mxu1  ;;  %v1130_v34 = vsel %vm922_vm3, %v1129_v32, -inf  ;;  %v1587_v21 = vld [vmem:[#allocation10 + $0xa8] sm:$0xff] }
 0x69e   :  { %1131 = vmax.xlane.f32.xlu0 %v1130_v34  ;;  %v3671_v33 = vld [vmem:[#allocation9 + $0xa4] ss:$8 sps:$4 sm:$0xff]   ;;  %v3669_v34 = vld [vmem:[#allocation9 + $0xa0] ss:$8 sps:$4 sm:$0xff]  }
 0x69f   :  { %1505 = vmatpush2.bf16.msra.mxu0 %v3663_v13  ;;  %v3229_v13 = vcombine.low %v1590_v10, %v1594_v11  ;;  %v1682_v10 = vld [vmem:[#allocation10 + $0x3a0] sm:$0xff]  ;;  %v1679_v11 = vld [vmem:[#allocation10 + $0x388] sm:$0xff] }
 0x6a0   :  { %1506 = vmatprep.subr.bf16.mxu0 %v3668_v31  ;;  %v3231_v31 = vcombine.low %v1591_v12, %v1595_v15  ;;  %v1683_v15 = vld [vmem:[#allocation10 + $0x3a8] sm:$0xff] }
 0x727   :  { %v1132_v35 = vpop.xlane.xlu0 %1131 }
 0x728   :  { %v1133_v36 = vsub.f32 %v1129_v32, %v1132_v35  ;;  %v3666_v32 = vld [vmem:[#allocation9 + $0xb0] ss:$8 sps:$4 sm:$0xff]   ;;  %v3674_v35 = vld [vmem:[#allocation9 + $0x94] ss:$8 sps:$4 sm:$0xff]  }
 0x729   :  { %1507 = vmatpush2.bf16.msra.mxu0 %v3666_v32  ;;  %v3222_v32 = vcombine.high %v1582_v26, %v1586_v27 }
 0x72a   :  { %v1134_v37 = vmul.f32 1.442695, %v1133_v36  ;;  %1508 = vmatprep.subr.bf16.mxu0 %v3671_v33  ;;  %v3672_v36 = vld [vmem:[#allocation9 + $0x90] ss:$8 sps:$4 sm:$0xff]   ;;  %v3224_v33 = vcombine.high %v1583_v30, %v1587_v21 }
 0x72c   :  { %3786 = vpow2.f32 %v1134_v37 }
 0x72d   :  { %1509 = vmatpush2.bf16.msra.mxu0 %v3669_v34  ;;  %v1574_v34 = vld [vmem:[#allocation10 + $0x40] sm:$0xff] }
 0x72e   :  { %1510 = vmatprep.subr.bf16.mxu0 %v3674_v35  ;;  %v1578_v35 = vld [vmem:[#allocation10 + $0x60] sm:$0xff] }
 0x731   :  { %1511 = vmatpush2.bf16.msra.mxu0 %v3672_v36  ;;  %v1575_v36 = vld [vmem:[#allocation10 + $0x48] sm:$0xff] }
 0x739   :  { %v3787_v38 = vpop.eup %3786 }
 0x73a   :  { %v1136_v39 = vsel %vm922_vm3, %v3787_v38, 0.0 }
 0x73b   :  { %1137 = vadd.xlane.f32.xlu1 %v1136_v39 }
 0x7c4   :  { %v1138_v28 = vpop.xlane.xlu1 %1137 }
 0x7c5   :  { %3788 = vrcp.f32 %v1138_v28 }
 0x7d2   :  { %v3789_v1 = vpop.eup %3788 }
 0x7d3   :  { %v1140_v40 = vmul.f32 %v3789_v1, %v3787_v38  ;;  %v3677_v1 = vld [vmem:[#allocation9 + $0x84] ss:$8 sps:$4 sm:$0xff]  }
 0x7d4   :  { %1512 = vmatprep.subr.bf16.mxu0 %v3677_v1 }
 0x7d5   :  { %v1141_v0 = vpack.c.bf16 %v1140_v40, %v1140_v40  ;;  %v3675_v40 = vld [vmem:[#allocation9 + $0x80] ss:$8 sps:$4 sm:$0xff]  }
 0x7d6   :  { %1513 = vmatpush2.bf16.msra.mxu0 %v3675_v40  ;;  %v1566_v40 = vld [vmem:[#allocation10] sm:$0xff] }
 0x7d7   :  { %3454 = vmatmul.mubr.msk.bf16.vlgmr.msra.gmra.mxu1 %vm922_vm3, %v1141_v0 }
 0x7d8   :  { %3458 = vmatpush3.bf16.xpose.msra.mxu1 %v1085_v2  ;;  %3459 = vmatprep.mubr.msk.bf16.mxu1 %vm3991_vm0, %v3990_v7 }
 0x7d9   :  { %3463 = vmatprep.subr.bf16.mxu1 %v3990_v7 }
 0x7df   :  { %3460 = vmatmul.mubr.bf16.vlgmr.msra.gmra.mxu1 %v1083_v42 }
 0x7e0   :  { %3464 = vmatpush3.bf16.msra.mxu1 %v1246_v43  ;;  %3465 = vmatprep.mubr.msk.bf16.mxu1 %vm3991_vm0, %v3990_v7 }
 0x897   :  { %v4176_v29 = vpop.f32.mrf.mxu1 }
 0x898   :  { %v1288_v5 = vpack.c.bf16 %v4176_v29, %v4135_v47  ;;  %v1610_v29 = vld [vmem:[#allocation10 + $0x160] sm:$0xff] }
 0x899   :  { %v3455_v44 = vpop.f32.mrf.mxu1 }
 0x89a   :  { %v1622_v44 = vld [vmem:[#allocation10 + $0x1c0] sm:$0xff] }
 0x89b   :  { %v1185_v45 = vpop.f32.mrf.mxu1 }
 0x89c   :  { %v1626_v45 = vld [vmem:[#allocation10 + $0x1e0] sm:$0xff] }
 0x89d   :  { %v3456_v46 = vpop.f32.mrf.mxu1 }
 0x89e   :  { %v1623_v46 = vld [vmem:[#allocation10 + $0x1c8] sm:$0xff] }
 0x89f   :  { %v1222_v48 = vpop.f32.mrf.mxu1 }
 0x8a0   :  { %v1223_v49 = vadd.f32 %v1222_v48, %v4137_v51  ;;  %v3261_v48 = vcombine.low %v1622_v44, %v1626_v45 }
 0x8a1   :  { %v3461_v50 = vpop.f32.mrf.mxu1 }
 0x8a2   :  { %v1228_v14 = vsel %vm867_vm2, -3.4028235e+38, %v1223_v49  ;;  %v3262_v49 = vcombine.high %v1622_v44, %v1626_v45  ;;  %v1627_v50 = vld [vmem:[#allocation10 + $0x1e8] sm:$0xff]  ;;  %v1686_v45 = vld [vmem:[#allocation10 + $0x3c0] sm:$0xff] }
 0x8a3   :  { %v1225_v52 = vpop.f32.mrf.mxu1  ;;  %v1229_v53 = vmax.f32 %v1228_v14, -3.4028235e+38  ;;  %v1614_v14 = vld [vmem:[#allocation10 + $0x180] sm:$0xff] }
 0x8a4   :  { %v1618_v52 = vld [vmem:[#allocation10 + $0x1a0] sm:$0xff]  ;;  %2334 = vmatprep.subr.bf16.mxu1 %v3262_v49  ;;  %v1691_v49 = vld [vmem:[#allocation10 + $0x3e8] sm:$0xff] }
 0x8a5   :  { %v3462_v54 = vpop.f32.mrf.mxu1  ;;  %v1230_v55 = vsel %vm922_vm3, %v1229_v53, -inf }
 0x8a6   :  { %1231 = vmax.xlane.f32.xlu0 %v1230_v55  ;;  %v3264_v54 = vcombine.high %v1623_v46, %v1627_v50  ;;  %v3254_v55 = vcombine.high %v1614_v14, %v1618_v52 }
 0x8a8   :  { %2377 = vmatprep.subr.bf16.mxu0 %v3264_v54 }
 0x92f   :  { %v1232_v7 = vpop.xlane.xlu0 %1231 }
 0x930   :  { %v1233_v56 = vsub.f32 %v1229_v53, %v1232_v7  ;;  %v3263_v53 = vcombine.low %v1623_v46, %v1627_v50  ;;  %v1619_v7 = vld [vmem:[#allocation10 + $0x1a8] sm:$0xff]  ;;  %v1690_v46 = vld [vmem:[#allocation10 + $0x3e0] sm:$0xff] }
 0x931   :  { %v3325_v54 = vcombine.low %v1686_v45, %v1690_v46 }
 0x932   :  { %v1234_v57 = vmul.f32 1.442695, %v1233_v56  ;;  %v1606_v56 = vld [vmem:[#allocation10 + $0x140] sm:$0xff] }
 0x933   :  { %v3246_v60 = vcombine.high %v1606_v56, %v1610_v29  ;;  %v3245_v4 = vcombine.low %v1606_v56, %v1610_v29  ;;  %v3831_v29 = vld [vmem:[#allocation2 + $0x8] sm:$0xff] }
 0x934   :  { %3790 = vpow2.f32 %v1234_v57  ;;  %v1607_v57 = vld [vmem:[#allocation10 + $0x148] sm:$0xff] }
 0x941   :  { %v4183_v58 = vpop.eup %3790 }
 0x942   :  { %v1236_v51 = vsel %vm922_vm3, %v4183_v58, 0.0 }
 0x943   :  { %1237 = vadd.xlane.f32.xlu1 %v1236_v51  ;;  %v3253_v51 = vcombine.low %v1614_v14, %v1618_v52  ;;  %v3326_v52 = vcombine.high %v1686_v45, %v1690_v46  ;;  %v1647_v45 = vld [vmem:[#allocation10 + $0x288] sm:$0xff] }
 0x944   :  { %v1651_v46 = vld [vmem:[#allocation10 + $0x2a8] sm:$0xff] }
 0x9cc   :  { %v1238_v37 = vpop.xlane.xlu1 %1237 }
 0x9cd   :  { %3792 = vrcp.f32 %v1238_v37  ;;  %v1579_v37 = vld [vmem:[#allocation10 + $0x68] sm:$0xff] }
 0x9ce   :  { %v3216_v1 = vcombine.high %v1575_v36, %v1579_v37 }
 0x9da   :  { %v3793_v38 = vpop.eup %3792 }
 0x9db   :  { %v1240_v39 = vmul.f32 %v3793_v38, %v4183_v58  ;;  %v1611_v58 = vld [vmem:[#allocation10 + $0x168] sm:$0xff]  ;;  %v3221_v38 = vcombine.low %v1582_v26, %v1586_v27  ;;  %v1674_v26 = vld [vmem:[#allocation10 + $0x360] sm:$0xff] }
 0x9dc   :  { %v3248_v18 = vcombine.high %v1607_v57, %v1611_v58  ;;  %v3247_v6 = vcombine.low %v1607_v57, %v1611_v58  ;;  %v1671_v27 = vld [vmem:[#allocation10 + $0x348] sm:$0xff] }
 0x9dd   :  { %v1241_v28 = vpack.c.bf16 %v1240_v39, %v1240_v39  ;;  %v3223_v39 = vcombine.low %v1583_v30, %v1587_v21  ;;  %v1675_v21 = vld [vmem:[#allocation10 + $0x368] sm:$0xff] }
 0x9df   :  { %3466 = vmatmul.mubr.msk.bf16.vlgmr.msra.gmra.mxu1 %vm922_vm3, %v1241_v28  ;;  %v3214_v28 = vcombine.high %v1574_v34, %v1578_v35 }
 0x9e0   :  { %2335 = vmatpush1.bf16.msra.mxu1 %v3261_v48  ;;  %v1687_v48 = vld [vmem:[#allocation10 + $0x3c8] sm:$0xff] }
 0x9e1   :  { %2336 = vmatprep.subr.bf16.mxu1 %v3254_v55  ;;  %v3327_v55 = vcombine.low %v1687_v48, %v1691_v49 }
 0x9e4   :  { %2337 = vmatpush1.bf16.msra.mxu1 %v3253_v51  ;;  %v3832_v51 = vld [vmem:[#allocation2 + $0x10] sm:$0xff] }
 0x9e5   :  { %2338 = vmatprep.subr.bf16.mxu1 %v3246_v60 }
 0x9e8   :  { %2339 = vmatpush1.bf16.msra.mxu1 %v3245_v4 }
 0x9e9   :  { %2340 = vmatprep.subr.bf16.mxu1 %v3238_v8 }
 0x9ec   :  { %2341 = vmatpush1.bf16.msra.mxu1 %v3237_v16 }
 0x9ed   :  { %2342 = vmatprep.subr.bf16.mxu1 %v3230_v20  ;;  %v3320_v20 = vcombine.high %v1679_v11, %v1683_v15 }
 0x9f0   :  { %2343 = vmatpush1.bf16.msra.mxu1 %v3229_v13 }
 0x9f1   :  { %2344 = vmatprep.subr.bf16.mxu1 %v3222_v32  ;;  %v3312_v32 = vcombine.high %v1671_v27, %v1675_v21 }
 0x9f4   :  { %2345 = vmatpush1.bf16.msra.mxu1 %v3221_v38 }
 0x9f5   :  { %2346 = vmatprep.subr.bf16.mxu1 %v3214_v28 }
 0xa9f   :  { %v1282_v0 = vpop.f32.mrf.mxu1 }
 0xaa0   :  { %v1289_v2 = vpack.c.bf16 %v1282_v0, %v4157_v19  ;;  %v1615_v19 = vld [vmem:[#allocation10 + $0x188] sm:$0xff]  ;;  %v1570_v0 = vld [vmem:[#allocation10 + $0x20] sm:$0xff] }
 0xaa1   :  { %v3467_v41 = vpop.f32.mrf.mxu1  ;;  %v3256_v47 = vcombine.high %v1615_v19, %v1619_v7  ;;  %v3255_v59 = vcombine.low %v1615_v19, %v1619_v7  ;;  %v3205_v50 = vcombine.low %v1566_v40, %v1570_v0  ;;  %v3830_v7 = vld [vmem:[#allocation2] sm:$0xff] }
 0xaa2   :  { %1514 = vmatprep.mubr.bf16.mxu0 %v1289_v2  ;;  %v1567_v2 = vld [vmem:[#allocation10 + $0x8] sm:$0xff]  ;;  %v3213_v41 = vcombine.low %v1574_v34, %v1578_v35  ;;  %v1666_v34 = vld [vmem:[#allocation10 + $0x320] sm:$0xff] }
 0xaa3   :  { %v1285_v42 = vpop.f32.mrf.mxu1  ;;  %1515 = vmatmul.mubr.bf16.vlgmr.msra.gmra.mxu0 %v1288_v5  ;;  %v1571_v5 = vld [vmem:[#allocation10 + $0x28] sm:$0xff] }
 0xaa4   :  { %2378 = vmatpush1.bf16.msra.mxu0 %v3263_v53  ;;  %v3215_v42 = vcombine.low %v1575_v36, %v1579_v37  ;;  %v3208_v44 = vcombine.high %v1567_v2, %v1571_v5  ;;  %2347 = vmatpush1.bf16.msra.mxu1 %v3213_v41  ;;  %v3207_v14 = vcombine.low %v1567_v2, %v1571_v5  ;;  %v1663_v35 = vld [vmem:[#allocation10 + $0x308] sm:$0xff]  ;;  %v1646_v41 = vld [vmem:[#allocation10 + $0x280] sm:$0xff] }
 0xaa5   :  { %v3468_v43 = vpop.f32.mrf.mxu1  ;;  %2379 = vmatprep.subr.bf16.mxu0 %v3256_v47  ;;  %v3328_v53 = vcombine.high %v1687_v48, %v1691_v49  ;;  %v1667_v37 = vld [vmem:[#allocation10 + $0x328] sm:$0xff] }
 0xaa6   :  { %v3206_v43 = vcombine.high %v1566_v40, %v1570_v0  ;;  %v3304_v28 = vcombine.high %v1663_v35, %v1667_v37  ;;  %v1658_v40 = vld [vmem:[#allocation10 + $0x2e0] sm:$0xff]  ;;  %v1655_v0 = vld [vmem:[#allocation10 + $0x2c8] sm:$0xff] }
 0xaa7   :  { %v1659_v5 = vld [vmem:[#allocation10 + $0x2e8] sm:$0xff] }
 0xaa8   :  { %2380 = vmatpush1.bf16.msra.mxu0 %v3255_v59  ;;  %2348 = vmatprep.subr.bf16.mxu1 %v3206_v43  ;;  %v3295_v48 = vcombine.low %v1655_v0, %v1659_v5 }
 0xaa9   :  { %2381 = vmatprep.subr.bf16.mxu0 %v3248_v18  ;;  %2349 = vmatpush1.bf16.msra.mxu1 %v3205_v50  ;;  %v3288_v50 = vcombine.high %v1647_v45, %v1651_v46 }
 0xaaa   :  { %2350 = vmatprep.subr.bf16.mxu1 %v3326_v52  ;;  %v1642_v52 = vld [vmem:[#allocation10 + $0x260] sm:$0xff] }
 0xaac   :  { %2382 = vmatpush1.bf16.msra.mxu0 %v3247_v6 }
 0xaad   :  { %2383 = vmatprep.subr.bf16.mxu0 %v3240_v9  ;;  %2351 = vmatpush2.bf16.msra.mxu1 %v3325_v54  ;;  %v1678_v9 = vld [vmem:[#allocation10 + $0x380] sm:$0xff]  ;;  %v1643_v54 = vld [vmem:[#allocation10 + $0x268] sm:$0xff] }
 0xaae   :  { %v3318_v12 = vcombine.high %v1678_v9, %v1682_v10  ;;  %v3317_v16 = vcombine.low %v1678_v9, %v1682_v10  ;;  %v1628_v9 = vld [vmem:[#allocation10 + $0x1f0] sm:$0xff]  ;;  %v1625_v10 = vld [vmem:[#allocation10 + $0x1d8] sm:$0xff] }
 0xab0   :  { %2384 = vmatpush1.bf16.msra.mxu0 %v3239_v17  ;;  %v3319_v17 = vcombine.low %v1679_v11, %v1683_v15  ;;  %2352 = vmatprep.subr.bf16.mxu1 %v3318_v12  ;;  %v1629_v12 = vld [vmem:[#allocation10 + $0x1f8] sm:$0xff] }
 0xab1   :  { %2385 = vmatprep.subr.bf16.mxu0 %v3232_v25  ;;  %2353 = vmatpush2.bf16.msra.mxu1 %v3317_v16  ;;  %v1670_v25 = vld [vmem:[#allocation10 + $0x340] sm:$0xff]  ;;  %v3267_v16 = vcombine.low %v1625_v10, %v1629_v12 }
 0xab2   :  { %v3310_v30 = vcombine.high %v1670_v25, %v1674_v26  ;;  %v3309_v13 = vcombine.low %v1670_v25, %v1674_v26 }
 0xab4   :  { %2386 = vmatpush1.bf16.msra.mxu0 %v3231_v31  ;;  %v3311_v31 = vcombine.low %v1671_v27, %v1675_v21  ;;  %2354 = vmatprep.subr.bf16.mxu1 %v3310_v30 }
 0xab5   :  { %2387 = vmatprep.subr.bf16.mxu0 %v3224_v33  ;;  %2355 = vmatpush2.bf16.msra.mxu1 %v3309_v13  ;;  %v1662_v33 = vld [vmem:[#allocation10 + $0x300] sm:$0xff] }
 0xab6   :  { %v3302_v36 = vcombine.high %v1662_v33, %v1666_v34  ;;  %v3301_v38 = vcombine.low %v1662_v33, %v1666_v34 }
 0xab8   :  { %2388 = vmatpush1.bf16.msra.mxu0 %v3223_v39  ;;  %v3303_v39 = vcombine.low %v1663_v35, %v1667_v37  ;;  %2356 = vmatprep.subr.bf16.mxu1 %v3302_v36 }
 0xab9   :  { %2389 = vmatprep.subr.bf16.mxu0 %v3216_v1  ;;  %v1654_v1 = vld [vmem:[#allocation10 + $0x2c0] sm:$0xff]  ;;  %2357 = vmatpush2.bf16.msra.mxu1 %v3301_v38 }
 0xaba   :  { %v3294_v2 = vcombine.high %v1654_v1, %v1658_v40  ;;  %v3293_v43 = vcombine.low %v1654_v1, %v1658_v40 }
 0xabc   :  { %2390 = vmatpush1.bf16.msra.mxu0 %v3215_v42  ;;  %v1650_v42 = vld [vmem:[#allocation10 + $0x2a0] sm:$0xff]  ;;  %2358 = vmatprep.subr.bf16.mxu1 %v3294_v2  ;;  %v1620_v2 = vld [vmem:[#allocation10 + $0x1b0] sm:$0xff] }
 0xabd   :  { %2391 = vmatprep.subr.bf16.mxu0 %v3208_v44  ;;  %v3296_v44 = vcombine.high %v1655_v0, %v1659_v5  ;;  %v3286_v49 = vcombine.high %v1646_v41, %v1650_v42  ;;  %2359 = vmatpush2.bf16.msra.mxu1 %v3293_v43  ;;  %v1616_v0 = vld [vmem:[#allocation10 + $0x190] sm:$0xff]  ;;  %v1617_v5 = vld [vmem:[#allocation10 + $0x198] sm:$0xff] }
 0xabe   :  { %v1608_v43 = vld [vmem:[#allocation10 + $0x150] sm:$0xff]  ;;  %v3258_v22 = vcombine.high %v1616_v0, %v1620_v2 }
 0xabf   :  { %2360 = vmatprep.subr.bf16.mxu1 %v3286_v49 }
 0xac0   :  { %2392 = vmatpush1.bf16.msra.mxu0 %v3207_v14  ;;  %v1638_v14 = vld [vmem:[#allocation10 + $0x240] sm:$0xff] }
 0xac1   :  { %2393 = vmatprep.subr.bf16.mxu0 %v3328_v53  ;;  %v1639_v53 = vld [vmem:[#allocation10 + $0x248] sm:$0xff] }
 0xac4   :  { %2394 = vmatpush2.bf16.msra.mxu0 %v3327_v55  ;;  %v3285_v55 = vcombine.low %v1646_v41, %v1650_v42  ;;  %v1621_v41 = vld [vmem:[#allocation10 + $0x1b8] sm:$0xff] }
 0xac5   :  { %2395 = vmatprep.subr.bf16.mxu0 %v3320_v20  ;;  %v3259_v49 = vcombine.low %v1617_v5, %v1621_v41 }
 0xac6   :  { %2361 = vmatpush2.bf16.msra.mxu1 %v3285_v55  ;;  %v1605_v55 = vld [vmem:[#allocation10 + $0x138] sm:$0xff] }
 0xac8   :  { %2396 = vmatpush2.bf16.msra.mxu0 %v3319_v17  ;;  %v3268_v17 = vcombine.high %v1625_v10, %v1629_v12  ;;  %v1589_v10 = vld [vmem:[#allocation10 + $0xb8] sm:$0xff] }
 0xac9   :  { %2397 = vmatprep.subr.bf16.mxu0 %v3312_v32 }
 0xacc   :  { %2398 = vmatpush2.bf16.msra.mxu0 %v3311_v31  ;;  %v117_v31 = vld [vmem:[%s4246_s3] sm:$0x3]  ;;  %s3992_s3 = smov [#allocation13]  }
 0xacd   :  { %2399 = vmatprep.subr.bf16.mxu0 %v3304_v28  ;;  %v1557_v33 = vrot.slane %v117_v31, %v146_v23  ;;  %v1553_v35 = vrot.slane %v117_v31, %v142_v24  ;;  %v3260_v24 = vcombine.high %v1617_v5, %v1621_v41  ;;  %v1568_v31 = vld [vmem:[#allocation10 + $0x10] sm:$0xff]  ;;  %s3057_s20 = sshll.u32 %s3992_s3, 4  ;;  %s3058_s20 = int_to_ptr.vmem [resolvable:$true] %s3057_s20 }
 0xace   :  { %s3946_s4 = scalar_lea.vmem %s3058_s20, 512  ;;  %p3951_p3 = scmp.lt.s32.totalorder %s3058_s20, %s3058_s20 }
 0xacf   :  { %p3947_p2 = scmp.ne.s32.totalorder %s3058_s20, %s3946_s4  ;;  %p3952_p4 = scmp.lt.s32.totalorder %s3946_s4, %s3946_s4 }
 0xad0   :  { %2400 = vmatpush2.bf16.msra.mxu0 %v3303_v39 }
 0xad1   :  { %2401 = vmatprep.subr.bf16.mxu0 %v3296_v44  ;;  %v1612_v44 = vld [vmem:[#allocation10 + $0x170] sm:$0xff]  ;;  %p3953_p5 = por %p3952_p4, %p3951_p3 }
 0xad3   :  { %p3954_p6 = pnand %p3953_p5, %p3947_p2 }
 0xad4   :  { %2402 = vmatpush2.bf16.msra.mxu0 %v3295_v48  ;;  %v3257_v48 = vcombine.low %v1616_v0, %v1620_v2 }
 0xad5   :  { %2403 = vmatprep.subr.bf16.mxu0 %v3288_v50  ;;  %v3250_v50 = vcombine.high %v1608_v43, %v1612_v44 }
 0xb63   :  { %v1516_v19 = vpop.f32.mrf.mxu0 }
 0xb64   :  { %v4192_v56 = vadd.f32 %v3830_v7, %v1516_v19  ;;  %v3287_v19 = vcombine.low %v1647_v45, %v1651_v46  ;;  %v3278_v7 = vcombine.high %v1638_v14, %v1642_v52  ;;  %v1609_v45 = vld [vmem:[#allocation10 + $0x158] sm:$0xff] }
 0xb65   :  { %v1518_v47 = vpop.f32.mrf.mxu0  ;;  %v1613_v46 = vld [vmem:[#allocation10 + $0x178] sm:$0xff] }
 0xb66   :  { %v4194_v57 = vadd.f32 %v3831_v29, %v1518_v47  ;;  %v1529_v60 = vmul.f32 %v4192_v56, %v4192_v56  ;;  %v3280_v47 = vcombine.high %v1639_v53, %v1643_v54  ;;  %v1630_v29 = vld [vmem:[#allocation10 + $0x200] sm:$0xff]  ;;  %2404 = vmatpush2.bf16.msra.mxu0 %v3287_v19  ;;  %2362 = vmatprep.subr.bf16.mxu1 %v3278_v7 }
 0xb67   :  { %v1520_v58 = vpop.f32.mrf.mxu0  ;;  %v3249_v19 = vcombine.low %v1608_v43, %v1612_v44  ;;  %v3251_v7 = vcombine.low %v1609_v45, %v1613_v46  ;;  %v1684_v43 = vld [vmem:[#allocation10 + $0x3b0] sm:$0xff] }
 0xb68   :  { %v4196_v59 = vadd.f32 %v3832_v51, %v1520_v58  ;;  %v1530_v18 = vmul.f32 %v4194_v57, %v4194_v57  ;;  %v1634_v58 = vld [vmem:[#allocation10 + $0x220] sm:$0xff]  ;;  %v1631_v51 = vld [vmem:[#allocation10 + $0x208] sm:$0xff]  ;;  %2405 = vmatprep.subr.bf16.mxu0 %v3280_v47 }
 0xb69   :  { %v1522_v61 = vpop.f32.mrf.mxu0 }
 0xb6a   :  { %v4202_v63 = vadd.f32 %v3833_v62, %v1522_v61  ;;  %v1533_v3 = vadd.f32 %v1530_v18, %v1529_v60  ;;  %v1531_v4 = vmul.f32 %v4196_v59, %v4196_v59  ;;  %v1635_v60 = vld [vmem:[#allocation10 + $0x228] sm:$0xff]  ;;  %v3277_v18 = vcombine.low %v1638_v14, %v1642_v52  ;;  %v1600_v52 = vld [vmem:[#allocation10 + $0x110] sm:$0xff] }
 0xb6b   :  { %v3279_v61 = vcombine.low %v1639_v53, %v1643_v54  ;;  %v3270_v62 = vcombine.high %v1630_v29, %v1634_v58  ;;  %v3252_v14 = vcombine.high %v1609_v45, %v1613_v46  ;;  %v1604_v53 = vld [vmem:[#allocation10 + $0x130] sm:$0xff]  ;;  %v1601_v54 = vld [vmem:[#allocation10 + $0x118] sm:$0xff] }
 0xb6c   :  { %1534 = vadd.xlane.f32.xlu0 %v1533_v3  ;;  %v1532_v6 = vmul.f32 %v4202_v63, %v4202_v63  ;;  %v3272_v3 = vcombine.high %v1631_v51, %v1635_v60  ;;  %2363 = vmatpush2.bf16.msra.mxu1 %v3277_v18  ;;  %v3242_v47 = vcombine.high %v1600_v52, %v1604_v53  ;;  %v1597_v18 = vld [vmem:[#allocation10 + $0xf8] sm:$0xff] }
 0xb6d   :  { %2406 = vmatpush2.bf16.msra.mxu0 %v3279_v61  ;;  %2364 = vmatprep.subr.bf16.mxu1 %v3270_v62  ;;  %v3241_v61 = vcombine.low %v1600_v52, %v1604_v53  ;;  %v3243_v62 = vcombine.low %v1601_v54, %v1605_v55  ;;  %v1677_v52 = vld [vmem:[#allocation10 + $0x378] sm:$0xff] }
 0xb6e   :  { %v1536_v8 = vadd.f32 %v1532_v6, %v1531_v4  ;;  %v3269_v4 = vcombine.low %v1630_v29, %v1634_v58  ;;  %v3271_v6 = vcombine.low %v1631_v51, %v1635_v60  ;;  %2407 = vmatprep.subr.bf16.mxu0 %v3272_v3  ;;  %v3244_v29 = vcombine.high %v1601_v54, %v1605_v55  ;;  %v1592_v58 = vld [vmem:[#allocation10 + $0xd0] sm:$0xff]  ;;  %v1593_v60 = vld [vmem:[#allocation10 + $0xd8] sm:$0xff] }
 0xb6f   :  { %v1596_v51 = vld [vmem:[#allocation10 + $0xf0] sm:$0xff]  ;;  %v3235_v12 = vcombine.low %v1593_v60, %v1597_v18 }
 0xb70   :  { %1537 = vadd.xlane.f32.xlu1 %v1536_v8  ;;  %2365 = vmatpush2.bf16.msra.mxu1 %v3269_v4  ;;  %v1624_v8 = vld [vmem:[#allocation10 + $0x1d0] sm:$0xff]  ;;  %v3234_v3 = vcombine.high %v1592_v58, %v1596_v51  ;;  %v3236_v4 = vcombine.high %v1593_v60, %v1597_v18 }
 0xb71   :  { %2408 = vmatpush2.bf16.msra.mxu0 %v3271_v6  ;;  %v3266_v11 = vcombine.high %v1624_v8, %v1628_v9  ;;  %v3265_v15 = vcombine.low %v1624_v8, %v1628_v9  ;;  %v1584_v6 = vld [vmem:[#allocation10 + $0x90] sm:$0xff]  ;;  %v1585_v9 = vld [vmem:[#allocation10 + $0x98] sm:$0xff] }
 0xb72   :  { %2463 = vmatprep.subr.bf16.mxu0 %v3268_v17  ;;  %v1588_v8 = vld [vmem:[#allocation10 + $0xb0] sm:$0xff] }
 0xb73   :  { %2420 = vmatprep.subr.bf16.mxu1 %v3266_v11  ;;  %v3233_v11 = vcombine.low %v1592_v58, %v1596_v51  ;;  %v1576_v17 = vld [vmem:[#allocation10 + $0x50] sm:$0xff]  ;;  %v1669_v58 = vld [vmem:[#allocation10 + $0x338] sm:$0xff] }
 0xbf5   :  { %v1535_v20 = vpop.xlane.xlu0 %1534 }
 0xbf6   :  { %v1539_v25 = vmul.f32 0.00390625, %v1535_v20  ;;  %v1580_v20 = vld [vmem:[#allocation10 + $0x70] sm:$0xff] }
 0xbf8   :  { %v1541_v26 = vadd.f32 1e-06, %v1539_v25  ;;  %v1577_v25 = vld [vmem:[#allocation10 + $0x58] sm:$0xff] }
 0xbf9   :  { %v1538_v27 = vpop.xlane.xlu1 %1537 }
 0xbfa   :  { %3794 = vrsqrt.f32 %v1541_v26  ;;  %v1540_v30 = vmul.f32 0.00390625, %v1538_v27  ;;  %v1581_v26 = vld [vmem:[#allocation10 + $0x78] sm:$0xff]  ;;  %v3225_v27 = vcombine.low %v1584_v6, %v1588_v8 }
 0xbfc   :  { %v1542_v21 = vadd.f32 1e-06, %v1540_v30  ;;  %v3227_v30 = vcombine.low %v1585_v9, %v1589_v10 }
 0xbfe   :  { %3796 = vrsqrt.f32 %v1542_v21  ;;  %v3218_v21 = vcombine.high %v1576_v17, %v1580_v20 }
 0xc07   :  { %v3795_v13 = vpop.eup %3794 }
 0xc08   :  { %v1546_v32 = vmul.f32 %v3795_v13, %v4194_v57  ;;  %v1545_v34 = vmul.f32 %v3795_v13, %v4192_v56  ;;  %v3220_v13 = vcombine.high %v1577_v25, %v1581_v26 }
 0xc0a   :  { %v1561_v39 = vmul.f32 %v1557_v33, %v1546_v32  ;;  %v1560_v1 = vmul.f32 %v1553_v35, %v1545_v34  ;;  %v1572_v32 = vld [vmem:[#allocation10 + $0x30] sm:$0xff]  ;;  %v1573_v34 = vld [vmem:[#allocation10 + $0x38] sm:$0xff] }
 0xc0b   :  { %v3797_v36 = vpop.eup %3796  ;;  %v3209_v0 = vcombine.low %v1568_v31, %v1572_v32 }
 0xc0c   :  { %v1548_v37 = vmul.f32 %v3797_v36, %v4202_v63  ;;  %v1547_v38 = vmul.f32 %v3797_v36, %v4196_v59  ;;  %v3219_v36 = vcombine.low %v1577_v25, %v1581_v26 }
 0xc0e   :  { %v1563_v28 = vmul.f32 %v1557_v33, %v1548_v37  ;;  %v1562_v40 = vmul.f32 %v1553_v35, %v1547_v38  ;;  %v1569_v33 = vld [vmem:[#allocation10 + $0x18] sm:$0xff]  ;;  %v3217_v35 = vcombine.low %v1576_v17, %v1580_v20  ;;  %v3210_v37 = vcombine.high %v1568_v31, %v1572_v32 }
 0xc0f   :  { %v3212_v38 = vcombine.high %v1569_v33, %v1573_v34  ;;  %v3211_v2 = vcombine.low %v1569_v33, %v1573_v34  ;;  %v1653_v17 = vld [vmem:[#allocation10 + $0x2b8] sm:$0xff] }
 0xc10   :  { %v1565_v42 = vpack.c.bf16 %v1563_v28, %v1561_v39  ;;  %v4219_v23 = vpack.c.bf16 %v1562_v40, %v1560_v1  ;;  %v1688_v39 = vld [vmem:[#allocation10 + $0x3d0] sm:$0xff]  ;;  %v1689_v1 = vld [vmem:[#allocation10 + $0x3d8] sm:$0xff] }
 0xc11   :  { %v1692_v28 = vld [vmem:[#allocation10 + $0x3f0] sm:$0xff]  ;;  %v1693_v40 = vld [vmem:[#allocation10 + $0x3f8] sm:$0xff] }
 0xc12   :  { %2366 = vmatprep.mubr.bf16.mxu1 %v1565_v42  ;;  %2409 = vmatprep.mubr.bf16.mxu0 %v1565_v42  ;;  %v3330_v5 = vcombine.high %v1688_v39, %v1692_v28  ;;  %v3332_v41 = vcombine.high %v1689_v1, %v1693_v40  ;;  %v3329_v44 = vcombine.low %v1688_v39, %v1692_v28  ;;  %v1645_v31 = vld [vmem:[#allocation10 + $0x278] sm:$0xff] }
 0xc13   :  { %2367 = vmatmul.mubr.bf16.vlgmr.msra.gmra.mxu1 %v4219_v23  ;;  %2410 = vmatmul.mubr.bf16.vlgmr.msra.gmra.mxu0 %v4219_v23  ;;  %v3331_v45 = vcombine.low %v1689_v1, %v1693_v40  ;;  %v1637_v39 = vld [vmem:[#allocation10 + $0x238] sm:$0xff] }
 0xc14   :  { %2421 = vmatpush1.bf16.msra.mxu1 %v3265_v15  ;;  %2464 = vmatpush1.bf16.msra.mxu0 %v3267_v16  ;;  %v3226_v15 = vcombine.high %v1584_v6, %v1588_v8  ;;  %v3228_v16 = vcombine.high %v1585_v9, %v1589_v10  ;;  %v1661_v6 = vld [vmem:[#allocation10 + $0x2f8] sm:$0xff] }
 0xc15   :  { %2452 = vmatprep.mubr.bf16.mxu1 %v1565_v42  ;;  %2495 = vmatprep.mubr.bf16.mxu0 %v1565_v42  ;;  %v1680_v42 = vld [vmem:[#allocation10 + $0x390] sm:$0xff] }
 0xc16   :  { %2422 = vmatprep.subr.bf16.mxu1 %v3258_v22  ;;  %2465 = vmatprep.subr.bf16.mxu0 %v3260_v24  ;;  %v1681_v22 = vld [vmem:[#allocation10 + $0x398] sm:$0xff]  ;;  %v3322_v46 = vcombine.high %v1680_v42, %v1684_v43  ;;  %v3321_v53 = vcombine.low %v1680_v42, %v1684_v43 }
 0xc17   :  { %v1685_v24 = vld [vmem:[#allocation10 + $0x3b8] sm:$0xff] }
 0xc18   :  { %2423 = vmatpush1.bf16.msra.mxu1 %v3257_v48  ;;  %2466 = vmatpush1.bf16.msra.mxu0 %v3259_v49  ;;  %v3324_v48 = vcombine.high %v1681_v22, %v1685_v24  ;;  %v1672_v49 = vld [vmem:[#allocation10 + $0x350] sm:$0xff]  ;;  %v3323_v54 = vcombine.low %v1681_v22, %v1685_v24  ;;  %v3686_v24 = vld [vmem:[#allocation12 + $0x64] ss:$8 sps:$4 sm:$0xff]  }
 0xc19   :  { %2424 = vmatprep.subr.bf16.mxu1 %v3250_v50  ;;  %2467 = vmatprep.subr.bf16.mxu0 %v3252_v14  ;;  %v1676_v50 = vld [vmem:[#allocation10 + $0x370] sm:$0xff]  ;;  %v1673_v14 = vld [vmem:[#allocation10 + $0x358] sm:$0xff] }
 0xc1a   :  { %v3314_v55 = vcombine.high %v1672_v49, %v1676_v50  ;;  %v3313_v51 = vcombine.low %v1672_v49, %v1676_v50  ;;  %v3315_v60 = vcombine.low %v1673_v14, %v1677_v52  ;;  %v3683_v42 = vld [vmem:[#allocation12 + $0x174] ss:$8 sps:$4 sm:$0xff]   ;;  %v3678_v43 = vld [vmem:[#allocation12 + $0x70] ss:$8 sps:$4 sm:$0xff]  }
 0xc1b   :  { %v3681_v22 = vld [vmem:[#allocation12 + $0x170] ss:$8 sps:$4 sm:$0xff]   ;;  %v3695_v49 = vld [vmem:[#allocation12 + $0x154] ss:$8 sps:$4 sm:$0xff]  }
 0xc1c   :  { %2425 = vmatpush1.bf16.msra.mxu1 %v3249_v19  ;;  %2468 = vmatpush1.bf16.msra.mxu0 %v3251_v7  ;;  %v3316_v19 = vcombine.high %v1673_v14, %v1677_v52  ;;  %v1664_v7 = vld [vmem:[#allocation10 + $0x310] sm:$0xff]  ;;  %v3698_v14 = vld [vmem:[#allocation12 + $0x44] ss:$8 sps:$4 sm:$0xff]  }
 0xc1d   :  { %2426 = vmatprep.subr.bf16.mxu1 %v3242_v47  ;;  %2469 = vmatprep.subr.bf16.mxu0 %v3244_v29  ;;  %v1668_v47 = vld [vmem:[#allocation10 + $0x330] sm:$0xff]  ;;  %v1665_v29 = vld [vmem:[#allocation10 + $0x318] sm:$0xff]  ;;  %v3701_v52 = vld [vmem:[#allocation12 + $0x144] ss:$8 sps:$4 sm:$0xff]  }
 0xc1e   :  { %v3306_v18 = vcombine.high %v1664_v7, %v1668_v47  ;;  %v3305_v8 = vcombine.low %v1664_v7, %v1668_v47  ;;  %v3307_v9 = vcombine.low %v1665_v29, %v1669_v58  ;;  %v3690_v50 = vld [vmem:[#allocation12 + $0x50] ss:$8 sps:$4 sm:$0xff]  }
 0xc1f   :  { %v3702_v7 = vld [vmem:[#allocation12 + $0x30] ss:$8 sps:$4 sm:$0xff]  }
 0xc20   :  { %2427 = vmatpush1.bf16.msra.mxu1 %v3241_v61  ;;  %2470 = vmatpush1.bf16.msra.mxu0 %v3243_v62  ;;  %v3308_v61 = vcombine.high %v1665_v29, %v1669_v58  ;;  %v1656_v62 = vld [vmem:[#allocation10 + $0x2d0] sm:$0xff]  ;;  %v3710_v29 = vld [vmem:[#allocation12 + $0x24] ss:$8 sps:$4 sm:$0xff]  }
 0xc21   :  { %2428 = vmatprep.subr.bf16.mxu1 %v3234_v3  ;;  %2471 = vmatprep.subr.bf16.mxu0 %v3236_v4  ;;  %v1660_v3 = vld [vmem:[#allocation10 + $0x2f0] sm:$0xff]  ;;  %v1657_v4 = vld [vmem:[#allocation10 + $0x2d8] sm:$0xff]  ;;  %v3713_v58 = vld [vmem:[#allocation12 + $0x124] ss:$8 sps:$4 sm:$0xff]  }
 0xc22   :  { %v3298_v10 = vcombine.high %v1656_v62, %v1660_v3  ;;  %v3297_v20 = vcombine.low %v1656_v62, %v1660_v3  ;;  %v3299_v25 = vcombine.low %v1657_v4, %v1661_v6  ;;  %v3705_v47 = vld [vmem:[#allocation12 + $0x130] ss:$8 sps:$4 sm:$0xff]  }
 0xc23   :  { %v3714_v62 = vld [vmem:[#allocation12 + $0x10] ss:$8 sps:$4 sm:$0xff]  }
 0xc24   :  { %2429 = vmatpush1.bf16.msra.mxu1 %v3233_v11  ;;  %2472 = vmatpush1.bf16.msra.mxu0 %v3235_v12  ;;  %v3300_v11 = vcombine.high %v1657_v4, %v1661_v6  ;;  %v1648_v12 = vld [vmem:[#allocation10 + $0x290] sm:$0xff]  ;;  %v3722_v4 = vld [vmem:[#allocation12 + $0x4] ss:$8 sps:$4 sm:$0xff]  }
 0xc25   :  { %2430 = vmatprep.subr.bf16.mxu1 %v3226_v15  ;;  %2473 = vmatprep.subr.bf16.mxu0 %v3228_v16  ;;  %v1652_v15 = vld [vmem:[#allocation10 + $0x2b0] sm:$0xff]  ;;  %v1649_v16 = vld [vmem:[#allocation10 + $0x298] sm:$0xff]  ;;  %v3725_v6 = vld [vmem:[#allocation12 + $0x104] ss:$8 sps:$4 sm:$0xff]  }
 0xc26   :  { %v3290_v26 = vcombine.high %v1648_v12, %v1652_v15  ;;  %v3289_v32 = vcombine.low %v1648_v12, %v1652_v15  ;;  %v3291_v33 = vcombine.low %v1649_v16, %v1653_v17  ;;  %v3717_v3 = vld [vmem:[#allocation12 + $0x110] ss:$8 sps:$4 sm:$0xff]   ;;  %v3731_v15 = vld [vmem:[#allocation12 + $0x1f4] ss:$8 sps:$4 sm:$0xff]  }
 0xc27   :  { %v3729_v12 = vld [vmem:[#allocation12 + $0x1f0] ss:$8 sps:$4 sm:$0xff]  }
 0xc28   :  { %2431 = vmatpush1.bf16.msra.mxu1 %v3225_v27  ;;  %2474 = vmatpush1.bf16.msra.mxu0 %v3227_v30  ;;  %v3292_v27 = vcombine.high %v1649_v16, %v1653_v17  ;;  %v1640_v30 = vld [vmem:[#allocation10 + $0x250] sm:$0xff]  ;;  %v3734_v16 = vld [vmem:[#allocation12 + $0xe4] ss:$8 sps:$4 sm:$0xff]  }
 0xc29   :  { %2432 = vmatprep.subr.bf16.mxu1 %v3218_v21  ;;  %2475 = vmatprep.subr.bf16.mxu0 %v3220_v13  ;;  %v1644_v21 = vld [vmem:[#allocation10 + $0x270] sm:$0xff]  ;;  %v1641_v13 = vld [vmem:[#allocation10 + $0x258] sm:$0xff]  ;;  %v3737_v17 = vld [vmem:[#allocation12 + $0x1e4] ss:$8 sps:$4 sm:$0xff]  }
 0xc2a   :  { %v3282_v34 = vcombine.high %v1640_v30, %v1644_v21  ;;  %v3281_v28 = vcombine.low %v1640_v30, %v1644_v21  ;;  %v3283_v1 = vcombine.low %v1641_v13, %v1645_v31  ;;  %v3738_v30 = vld [vmem:[#allocation12 + $0xd0] ss:$8 sps:$4 sm:$0xff]  }
 0xc2b   :  { %v3741_v21 = vld [vmem:[#allocation12 + $0x1d0] ss:$8 sps:$4 sm:$0xff]  }
 0xc2c   :  { %2433 = vmatpush1.bf16.msra.mxu1 %v3217_v35  ;;  %2476 = vmatpush1.bf16.msra.mxu0 %v3219_v36  ;;  %v3284_v35 = vcombine.high %v1641_v13, %v1645_v31  ;;  %v1632_v36 = vld [vmem:[#allocation10 + $0x210] sm:$0xff]  ;;  %v3746_v13 = vld [vmem:[#allocation12 + $0xc4] ss:$8 sps:$4 sm:$0xff]  }
 0xc2d   :  { %2434 = vmatprep.subr.bf16.mxu1 %v3210_v37  ;;  %2477 = vmatprep.subr.bf16.mxu0 %v3212_v38  ;;  %v1636_v37 = vld [vmem:[#allocation10 + $0x230] sm:$0xff]  ;;  %v1633_v38 = vld [vmem:[#allocation10 + $0x218] sm:$0xff]  ;;  %v3749_v31 = vld [vmem:[#allocation12 + $0x1c4] ss:$8 sps:$4 sm:$0xff]  }
 0xc2e   :  { %v3274_v40 = vcombine.high %v1632_v36, %v1636_v37 }
 0xc30   :  { %2435 = vmatpush1.bf16.msra.mxu1 %v3209_v0  ;;  %2478 = vmatpush1.bf16.msra.mxu0 %v3211_v2  ;;  %v3276_v0 = vcombine.high %v1633_v38, %v1637_v39  ;;  %v3273_v2 = vcombine.low %v1632_v36, %v1636_v37  ;;  %v3750_v36 = vld [vmem:[#allocation12 + $0xb0] ss:$8 sps:$4 sm:$0xff]  }
 0xc31   :  { %2436 = vmatprep.subr.bf16.mxu1 %v3330_v5  ;;  %2479 = vmatprep.subr.bf16.mxu0 %v3332_v41  ;;  %v3275_v5 = vcombine.low %v1633_v38, %v1637_v39  ;;  %v3680_v41 = vld [vmem:[#allocation12 + $0x74] ss:$8 sps:$4 sm:$0xff]   ;;  %v3753_v37 = vld [vmem:[#allocation12 + $0x1b0] ss:$8 sps:$4 sm:$0xff]   ;;  %v3758_v38 = vld [vmem:[#allocation12 + $0xa4] ss:$8 sps:$4 sm:$0xff]  }
 0xc32   :  { %v3761_v39 = vld [vmem:[#allocation12 + $0x1a4] ss:$8 sps:$4 sm:$0xff]  }
 0xc34   :  { %2437 = vmatpush2.bf16.msra.mxu1 %v3329_v44  ;;  %2480 = vmatpush2.bf16.msra.mxu0 %v3331_v45  ;;  %v3689_v44 = vld [vmem:[#allocation12 + $0x164] ss:$8 sps:$4 sm:$0xff]   ;;  %v3684_v45 = vld [vmem:[#allocation12 + $0x60] ss:$8 sps:$4 sm:$0xff]  }
 0xc35   :  { %2438 = vmatprep.subr.bf16.mxu1 %v3322_v46  ;;  %2481 = vmatprep.subr.bf16.mxu0 %v3324_v48  ;;  %v3687_v46 = vld [vmem:[#allocation12 + $0x160] ss:$8 sps:$4 sm:$0xff]   ;;  %v3692_v48 = vld [vmem:[#allocation12 + $0x54] ss:$8 sps:$4 sm:$0xff]  }
 0xc38   :  { %2439 = vmatpush2.bf16.msra.mxu1 %v3321_v53  ;;  %2482 = vmatpush2.bf16.msra.mxu0 %v3323_v54  ;;  %v3696_v53 = vld [vmem:[#allocation12 + $0x40] ss:$8 sps:$4 sm:$0xff]  }
 0xc39   :  { %2440 = vmatprep.subr.bf16.mxu1 %v3314_v55  ;;  %2483 = vmatprep.subr.bf16.mxu0 %v3316_v19  ;;  %v3699_v54 = vld [vmem:[#allocation12 + $0x140] ss:$8 sps:$4 sm:$0xff]   ;;  %v3704_v55 = vld [vmem:[#allocation12 + $0x34] ss:$8 sps:$4 sm:$0xff]  }
 0xc3a   :  { %v3707_v19 = vld [vmem:[#allocation12 + $0x134] ss:$8 sps:$4 sm:$0xff]  }
 0xc3c   :  { %2441 = vmatpush2.bf16.msra.mxu1 %v3313_v51  ;;  %2484 = vmatpush2.bf16.msra.mxu0 %v3315_v60  ;;  %v3708_v51 = vld [vmem:[#allocation12 + $0x20] ss:$8 sps:$4 sm:$0xff]  }
 0xc3d   :  { %2442 = vmatprep.subr.bf16.mxu1 %v3306_v18  ;;  %2485 = vmatprep.subr.bf16.mxu0 %v3308_v61  ;;  %v3711_v60 = vld [vmem:[#allocation12 + $0x120] ss:$8 sps:$4 sm:$0xff]   ;;  %v3716_v18 = vld [vmem:[#allocation12 + $0x14] ss:$8 sps:$4 sm:$0xff]  }
 0xc3e   :  { %v3719_v61 = vld [vmem:[#allocation12 + $0x114] ss:$8 sps:$4 sm:$0xff]  }
 0xc40   :  { %2443 = vmatpush2.bf16.msra.mxu1 %v3305_v8  ;;  %2486 = vmatpush2.bf16.msra.mxu0 %v3307_v9  ;;  %v3720_v8 = vld [vmem:[#allocation12] ss:$8 sps:$4 sm:$0xff]  }
 0xc41   :  { %2444 = vmatprep.subr.bf16.mxu1 %v3298_v10  ;;  %2487 = vmatprep.subr.bf16.mxu0 %v3300_v11  ;;  %v3723_v9 = vld [vmem:[#allocation12 + $0x100] ss:$8 sps:$4 sm:$0xff]   ;;  %v3728_v10 = vld [vmem:[#allocation12 + $0xf4] ss:$8 sps:$4 sm:$0xff]   ;;  %v3726_v11 = vld [vmem:[#allocation12 + $0xf0] ss:$8 sps:$4 sm:$0xff]  }
 0xc44   :  { %2445 = vmatpush2.bf16.msra.mxu1 %v3297_v20  ;;  %2488 = vmatpush2.bf16.msra.mxu0 %v3299_v25  ;;  %v3732_v20 = vld [vmem:[#allocation12 + $0xe0] ss:$8 sps:$4 sm:$0xff]  }
 0xc45   :  { %2446 = vmatprep.subr.bf16.mxu1 %v3290_v26  ;;  %2489 = vmatprep.subr.bf16.mxu0 %v3292_v27  ;;  %v3735_v25 = vld [vmem:[#allocation12 + $0x1e0] ss:$8 sps:$4 sm:$0xff]   ;;  %v3740_v26 = vld [vmem:[#allocation12 + $0xd4] ss:$8 sps:$4 sm:$0xff]  }
 0xc46   :  { %v3743_v27 = vld [vmem:[#allocation12 + $0x1d4] ss:$8 sps:$4 sm:$0xff]  }
 0xc48   :  { %2447 = vmatpush2.bf16.msra.mxu1 %v3289_v32  ;;  %2490 = vmatpush2.bf16.msra.mxu0 %v3291_v33  ;;  %v3744_v32 = vld [vmem:[#allocation12 + $0xc0] ss:$8 sps:$4 sm:$0xff]  }
 0xc49   :  { %2448 = vmatprep.subr.bf16.mxu1 %v3282_v34  ;;  %2491 = vmatprep.subr.bf16.mxu0 %v3284_v35  ;;  %v3747_v33 = vld [vmem:[#allocation12 + $0x1c0] ss:$8 sps:$4 sm:$0xff]   ;;  %v3752_v34 = vld [vmem:[#allocation12 + $0xb4] ss:$8 sps:$4 sm:$0xff]  }
 0xc4a   :  { %v3755_v35 = vld [vmem:[#allocation12 + $0x1b4] ss:$8 sps:$4 sm:$0xff]  }
 0xc4c   :  { %2449 = vmatpush2.bf16.msra.mxu1 %v3281_v28  ;;  %2492 = vmatpush2.bf16.msra.mxu0 %v3283_v1  ;;  %v3756_v28 = vld [vmem:[#allocation12 + $0xa0] ss:$8 sps:$4 sm:$0xff]  }
 0xc4d   :  { %2450 = vmatprep.subr.bf16.mxu1 %v3274_v40  ;;  %2493 = vmatprep.subr.bf16.mxu0 %v3276_v0  ;;  %v3759_v1 = vld [vmem:[#allocation12 + $0x1a0] ss:$8 sps:$4 sm:$0xff]   ;;  %v3764_v40 = vld [vmem:[#allocation12 + $0x94] ss:$8 sps:$4 sm:$0xff]  }
 0xc4e   :  { %v3767_v0 = vld [vmem:[#allocation12 + $0x194] ss:$8 sps:$4 sm:$0xff]  }
 0xc50   :  { %2451 = vmatpush2.bf16.msra.mxu1 %v3273_v2  ;;  %2494 = vmatpush2.bf16.msra.mxu0 %v3275_v5  ;;  %v3762_v2 = vld [vmem:[#allocation12 + $0x90] ss:$8 sps:$4 sm:$0xff]  }
 0xc51   :  { %2958 = vmatprep.subr.bf16.mxu1 %v3680_v41  ;;  %3001 = vmatprep.subr.bf16.mxu0 %v3683_v42  ;;  %v3765_v5 = vld [vmem:[#allocation12 + $0x190] ss:$8 sps:$4 sm:$0xff]   ;;  %v3770_v41 = vld [vmem:[#allocation12 + $0x84] ss:$8 sps:$4 sm:$0xff]  }
 0xc52   :  { %v3773_v42 = vld [vmem:[#allocation12 + $0x184] ss:$8 sps:$4 sm:$0xff]  }
 0xc53   :  { %2453 = vmatmul.mubr.bf16.vlgmr.msra.gmra.mxu1 %v4219_v23  ;;  %2496 = vmatmul.mubr.bf16.vlgmr.msra.gmra.mxu0 %v4219_v23  ;;  %v3693_v23 = vld [vmem:[#allocation12 + $0x150] ss:$8 sps:$4 sm:$0xff]  }
 0xc54   :  { %2959 = vmatpush1.bf16.msra.mxu1 %v3678_v43  ;;  %3002 = vmatpush1.bf16.msra.mxu0 %v3681_v22  ;;  %v3768_v43 = vld [vmem:[#allocation12 + $0x80] ss:$8 sps:$4 sm:$0xff]  }
 0xc55   :  { %2960 = vmatprep.subr.bf16.mxu1 %v3686_v24  ;;  %3003 = vmatprep.subr.bf16.mxu0 %v3689_v44  ;;  %v3771_v22 = vld [vmem:[#allocation12 + $0x180] ss:$8 sps:$4 sm:$0xff]  }
 0xc58   :  { %2961 = vmatpush1.bf16.msra.mxu1 %v3684_v45  ;;  %3004 = vmatpush1.bf16.msra.mxu0 %v3687_v46 }
 0xc59   :  { %2962 = vmatprep.subr.bf16.mxu1 %v3692_v48  ;;  %3005 = vmatprep.subr.bf16.mxu0 %v3695_v49 }
 0xc5c   :  { %2963 = vmatpush1.bf16.msra.mxu1 %v3690_v50  ;;  %3006 = vmatpush1.bf16.msra.mxu0 %v3693_v23 }
 0xc5d   :  { %2964 = vmatprep.subr.bf16.mxu1 %v3698_v14  ;;  %3007 = vmatprep.subr.bf16.mxu0 %v3701_v52 }
 0xc60   :  { %2965 = vmatpush1.bf16.msra.mxu1 %v3696_v53  ;;  %3008 = vmatpush1.bf16.msra.mxu0 %v3699_v54 }
 0xc61   :  { %2966 = vmatprep.subr.bf16.mxu1 %v3704_v55  ;;  %3009 = vmatprep.subr.bf16.mxu0 %v3707_v19 }
 0xc64   :  { %2967 = vmatpush1.bf16.msra.mxu1 %v3702_v7  ;;  %3010 = vmatpush1.bf16.msra.mxu0 %v3705_v47 }
 0xc65   :  { %2968 = vmatprep.subr.bf16.mxu1 %v3710_v29  ;;  %3011 = vmatprep.subr.bf16.mxu0 %v3713_v58 }
 0xc68   :  { %2969 = vmatpush1.bf16.msra.mxu1 %v3708_v51  ;;  %3012 = vmatpush1.bf16.msra.mxu0 %v3711_v60 }
 0xc69   :  { %2970 = vmatprep.subr.bf16.mxu1 %v3716_v18  ;;  %3013 = vmatprep.subr.bf16.mxu0 %v3719_v61 }
 0xc6c   :  { %2971 = vmatpush1.bf16.msra.mxu1 %v3714_v62  ;;  %3014 = vmatpush1.bf16.msra.mxu0 %v3717_v3 }
 0xc6d   :  { %2972 = vmatprep.subr.bf16.mxu1 %v3722_v4  ;;  %3015 = vmatprep.subr.bf16.mxu0 %v3725_v6 }
 0xc70   :  { %2973 = vmatpush1.bf16.msra.mxu1 %v3720_v8  ;;  %3016 = vmatpush1.bf16.msra.mxu0 %v3723_v9 }
 0xc71   :  { %2974 = vmatprep.subr.bf16.mxu1 %v3728_v10  ;;  %3017 = vmatprep.subr.bf16.mxu0 %v3731_v15 }
 0xc74   :  { %2975 = vmatpush2.bf16.msra.mxu1 %v3726_v11  ;;  %3018 = vmatpush2.bf16.msra.mxu0 %v3729_v12 }
 0xc75   :  { %2976 = vmatprep.subr.bf16.mxu1 %v3734_v16  ;;  %3019 = vmatprep.subr.bf16.mxu0 %v3737_v17 }
 0xc78   :  { %2977 = vmatpush2.bf16.msra.mxu1 %v3732_v20  ;;  %3020 = vmatpush2.bf16.msra.mxu0 %v3735_v25 }
 0xc79   :  { %2978 = vmatprep.subr.bf16.mxu1 %v3740_v26  ;;  %3021 = vmatprep.subr.bf16.mxu0 %v3743_v27 }
 0xc7c   :  { %2979 = vmatpush2.bf16.msra.mxu1 %v3738_v30  ;;  %3022 = vmatpush2.bf16.msra.mxu0 %v3741_v21 }
 0xc7d   :  { %2980 = vmatprep.subr.bf16.mxu1 %v3746_v13  ;;  %3023 = vmatprep.subr.bf16.mxu0 %v3749_v31 }
 0xc80   :  { %2981 = vmatpush2.bf16.msra.mxu1 %v3744_v32  ;;  %3024 = vmatpush2.bf16.msra.mxu0 %v3747_v33 }
 0xc81   :  { %2982 = vmatprep.subr.bf16.mxu1 %v3752_v34  ;;  %3025 = vmatprep.subr.bf16.mxu0 %v3755_v35 }
 0xc84   :  { %2983 = vmatpush2.bf16.msra.mxu1 %v3750_v36  ;;  %3026 = vmatpush2.bf16.msra.mxu0 %v3753_v37 }
 0xc85   :  { %2984 = vmatprep.subr.bf16.mxu1 %v3758_v38  ;;  %3027 = vmatprep.subr.bf16.mxu0 %v3761_v39 }
 0xc88   :  { %2985 = vmatpush2.bf16.msra.mxu1 %v3756_v28  ;;  %3028 = vmatpush2.bf16.msra.mxu0 %v3759_v1 }
 0xc89   :  { %2986 = vmatprep.subr.bf16.mxu1 %v3764_v40  ;;  %3029 = vmatprep.subr.bf16.mxu0 %v3767_v0 }
 0xc8c   :  { %2987 = vmatpush2.bf16.msra.mxu1 %v3762_v2  ;;  %3030 = vmatpush2.bf16.msra.mxu0 %v3765_v5 }
 0xc8d   :  { %2988 = vmatprep.subr.bf16.mxu1 %v3770_v41  ;;  %3031 = vmatprep.subr.bf16.mxu0 %v3773_v42 }
 0xc90   :  { %2989 = vmatpush2.bf16.msra.mxu1 %v3768_v43  ;;  %3032 = vmatpush2.bf16.msra.mxu0 %v3771_v22 }
 0xcd3   :  { %v4225_v24 = vpop.f32.mrf.mxu1  ;;  %v4227_v44 = vpop.f32.mrf.mxu0 }
 0xcd4   :  { %v3333_v50 = vmul.f32 -1.442695, %v4225_v24  ;;  %v3335_v47 = vmul.f32 -1.442695, %v4227_v44 }
 0xcd5   :  { %v2370_v45 = vpop.f32.mrf.mxu1  ;;  %v2413_v46 = vpop.f32.mrf.mxu0 }
 0xcd6   :  { %v3334_v23 = vmul.f32 -1.442695, %v2370_v45  ;;  %v3336_v14 = vmul.f32 -1.442695, %v2413_v46  ;;  %3798 = vpow2.f32 %v3333_v50 }
 0xcd7   :  { %v2372_v48 = vpop.f32.mrf.mxu1  ;;  %v2415_v49 = vpop.f32.mrf.mxu0 }
 0xcd8   :  { %v3337_v53 = vmul.f32 -1.442695, %v2372_v48  ;;  %v3339_v55 = vmul.f32 -1.442695, %v2415_v49  ;;  %3800 = vpow2.f32 %v3334_v23 }
 0xcd9   :  { %v2374_v52 = vpop.f32.mrf.mxu1  ;;  %v2417_v54 = vpop.f32.mrf.mxu0  ;;  %3802 = vpow2.f32 %v3336_v14 }
 0xcda   :  { %v3338_v19 = vmul.f32 -1.442695, %v2374_v52  ;;  %v3340_v7 = vmul.f32 -1.442695, %v2417_v54  ;;  %3804 = vpow2.f32 %v3337_v53 }
 0xcdb   :  { %3806 = vpow2.f32 %v3339_v55 }
 0xcdc   :  { %3808 = vpow2.f32 %v3338_v19 }
 0xcdd   :  { %3810 = vpow2.f32 %v3340_v7 }
 0xcde   :  { %3812 = vpow2.f32 %v3335_v47 }
 0xce3   :  { %v3799_v29 = vpop.eup %3798 }
 0xce4   :  { %v2530_v18 = vadd.f32 1.0, %v3799_v29 }
 0xce5   :  { %v3801_v58 = vpop.eup %3800 }
 0xce6   :  { %v3803_v51 = vpop.eup %3802  ;;  %v2531_v62 = vadd.f32 1.0, %v3801_v58  ;;  %3814 = vrcp.f32 %v2530_v18 }
 0xce7   :  { %v3805_v60 = vpop.eup %3804  ;;  %v2533_v4 = vadd.f32 1.0, %v3803_v51 }
 0xce8   :  { %v3807_v61 = vpop.eup %3806  ;;  %v2534_v8 = vadd.f32 1.0, %v3805_v60  ;;  %3816 = vrcp.f32 %v2531_v62 }
 0xce9   :  { %v3809_v3 = vpop.eup %3808  ;;  %v2536_v10 = vadd.f32 1.0, %v3807_v61  ;;  %3818 = vrcp.f32 %v2533_v4 }
 0xcea   :  { %v3811_v6 = vpop.eup %3810  ;;  %v2535_v11 = vadd.f32 1.0, %v3809_v3  ;;  %3820 = vrcp.f32 %v2534_v8 }
 0xceb   :  { %v3813_v9 = vpop.eup %3812  ;;  %v2537_v12 = vadd.f32 1.0, %v3811_v6  ;;  %3822 = vrcp.f32 %v2536_v10 }
 0xcec   :  { %v2532_v15 = vadd.f32 1.0, %v3813_v9  ;;  %3824 = vrcp.f32 %v2535_v11 }
 0xced   :  { %3826 = vrcp.f32 %v2537_v12 }
 0xcee   :  { %3828 = vrcp.f32 %v2532_v15 }
 0xcf3   :  { %v3815_v16 = vpop.eup %3814 }
 0xcf4   :  { %v2554_v40 = vmul.f32 %v3815_v16, %v4225_v24 }
 0xcf5   :  { %v3817_v17 = vpop.eup %3816 }
 0xcf6   :  { %v3819_v20 = vpop.eup %3818  ;;  %v2555_v38 = vmul.f32 %v3817_v17, %v2370_v45 }
 0xcf7   :  { %v3821_v25 = vpop.eup %3820  ;;  %v2557_v39 = vmul.f32 %v3819_v20, %v2413_v46 }
 0xcf8   :  { %v3823_v26 = vpop.eup %3822  ;;  %v2558_v34 = vmul.f32 %v3821_v25, %v2372_v48 }
 0xcf9   :  { %v3825_v21 = vpop.eup %3824  ;;  %v2560_v35 = vmul.f32 %v3823_v26, %v2415_v49 }
 0xcfa   :  { %v3827_v13 = vpop.eup %3826  ;;  %v2559_v28 = vmul.f32 %v3825_v21, %v2374_v52 }
 0xcfb   :  { %v3829_v33 = vpop.eup %3828  ;;  %v2561_v1 = vmul.f32 %v3827_v13, %v2417_v54 }
 0xcfc   :  { %v2556_v0 = vmul.f32 %v3829_v33, %v4227_v44 }
 0xd13   :  { %v2454_v27 = vpop.f32.mrf.mxu1  ;;  %v2497_v30 = vpop.f32.mrf.mxu0 }
 0xd14   :  { %v2562_v48 = vmul.f32 %v2554_v40, %v2454_v27  ;;  %v2564_v49 = vmul.f32 %v2556_v0, %v2497_v30 }
 0xd15   :  { %v2456_v31 = vpop.f32.mrf.mxu1  ;;  %v2499_v32 = vpop.f32.mrf.mxu0 }
 0xd16   :  { %v2563_v43 = vmul.f32 %v2555_v38, %v2456_v31  ;;  %v2565_v22 = vmul.f32 %v2557_v39, %v2499_v32 }
 0xd17   :  { %v2458_v36 = vpop.f32.mrf.mxu1  ;;  %v2501_v37 = vpop.f32.mrf.mxu0 }
 0xd18   :  { %v2566_v2 = vmul.f32 %v2558_v34, %v2458_v36  ;;  %v2568_v5 = vmul.f32 %v2560_v35, %v2501_v37 }
 0xd19   :  { %v2460_v41 = vpop.f32.mrf.mxu1  ;;  %v2503_v42 = vpop.f32.mrf.mxu0 }
 0xd1a   :  { %v2567_v50 = vmul.f32 %v2559_v28, %v2460_v41  ;;  %v2569_v23 = vmul.f32 %v2561_v1, %v2503_v42  ;;  %v2570_v45 = vpack.c.bf16 %v2566_v2, %v2562_v48  ;;  %v2572_v46 = vpack.c.bf16 %v2568_v5, %v2564_v49 }
 0xd1c   :  { %v2571_v14 = vpack.c.bf16 %v2567_v50, %v2563_v43  ;;  %v2573_v53 = vpack.c.bf16 %v2569_v23, %v2565_v22 }
 0xd1e   :  { %2990 = vmatprep.mubr.bf16.mxu1 %v2571_v14  ;;  %3033 = vmatprep.mubr.bf16.mxu0 %v2573_v53 }
 0xd1f   :  { %2991 = vmatmul.mubr.bf16.vlgmr.msra.gmra.mxu1 %v2570_v45  ;;  %3034 = vmatmul.mubr.bf16.vlgmr.msra.gmra.mxu0 %v2572_v46 }
 0xddf   :  { %v2992_v24 = vpop.f32.mrf.mxu1  ;;  %v3035_v44 = vpop.f32.mrf.mxu0 }
 0xde0   :  { %v3036_v52 = vadd.f32 %v3035_v44, %v2992_v24 }
 0xde1   :  { %v2994_v54 = vpop.f32.mrf.mxu1  ;;  %v3037_v55 = vpop.f32.mrf.mxu0 }
 0xde2   :  { %v3044_v19 = vadd.f32 %v3036_v52, %v4192_v56  ;;  %v3038_v7 = vadd.f32 %v3037_v55, %v2994_v54 }
 0xde3   :  { %v2996_v47 = vpop.f32.mrf.mxu1  ;;  %v3039_v29 = vpop.f32.mrf.mxu0 }
 0xde4   :  { %3048 = vst [vmem:[#allocation13] sm:$0xff] %v3044_v19  ;;  %v3045_v58 = vadd.f32 %v3038_v7, %v4194_v57  ;;  %v3040_v51 = vadd.f32 %v3039_v29, %v2996_v47 }
 0xde5   :  { %v2998_v60 = vpop.f32.mrf.mxu1  ;;  %v3041_v18 = vpop.f32.mrf.mxu0 }
 0xde6   :  { %3049 = vst [vmem:[#allocation13 + $0x8] sm:$0xff] %v3045_v58  ;;  %v3046_v61 = vadd.f32 %v3040_v51, %v4196_v59  ;;  %v3042_v62 = vadd.f32 %v3041_v18, %v2998_v60 }
 0xde8   :  { %3050 = vst [vmem:[#allocation13 + $0x10] sm:$0xff] %v3046_v61  ;;  %v3047_v3 = vadd.f32 %v3042_v62, %v4202_v63 }
 0xdea   :  { %3051 = vst [vmem:[#allocation13 + $0x18] sm:$0xff] %v3047_v3 }
 0xdeb   :  { %3957 = shalt.err (!%p3954_p6)
}
 0xdec   :  { %3063 = dma.vmem_to_hbm [thread:$0]  %s3058_s20, 512, %s4251_s8, [#allocation4], %s3983_s24, %s3983_s24, %s3984_s25  }
 0xded   :  { %3974 = dma.done.wait [#allocation4], 512  }
 0xdee   :  { %3975 = vsyncadd [#allocation4], 4294966784 }
 0xdef   :  { %3067 = vsyncpa [#allocation3], 1 }
 0xdf0   :  { %3068 = vsyncpa [#allocation8], 1 }
 0xdf1   :  { %3069 = vsyncpa [#allocation11], 1 }
 0xdf2   :  { %3070 = vsyncpa [#allocation4], 1 }
 0xdf3   :  { %3071 = vsyncpa [#allocation5], 1 }

</bundles_post_ra>
